<compile_context>
chip_gen: v5e
topology: v5e:2x2
jax: 0.10.0
libtpu: 0.0.40
codegen_flags: <defaults>
</compile_context>

<pallas_src>
import functools

import jax
import jax.numpy as jnp
from jax.experimental import pallas as pl
from jax.experimental.pallas import tpu as pltpu


# --------------------------------------------------------------------------
# Kernel A: merged (main|zd) NetConvDense pipeline + Dirichlet head, per sample
# --------------------------------------------------------------------------
def _fused_branch_kernel(patches_ref, w1_ref, s1_ref, t1_ref,
                         w2_ref, s2_ref, t2_ref,
                         wd_ref, sd_ref, td_ref,
                         dw_ref, ds_ref, dt_ref,
                         out_ref, pool_ref, patch2_ref,
                         *, kk, stride, hp1, wp1):
    """One batch sample of both conv branches (merged along channels).

    patches_ref: (1, 4*P, kk*kk*C_in)  conv1 im2col rows ordered (phase, hp, wp),
                 each pool phase padded to P rows (multiple of 8).
    out columns: [ h_main (img_h) | h_zd (img_h) | alphas (num_topics) ].
    """
    c1 = w1_ref.shape[1]                      # merged conv1 output channels
    p_rows = pool_ref.shape[0]                # padded rows per pool phase
    ho2 = (hp1 - kk) // stride + 1
    wo2 = (wp1 - kk) // stride + 1
    img2 = wd_ref.shape[1]                    # 2 * img_h_dim (merged dense width)
    img_h = dw_ref.shape[0]                   # img_h_dim (Dirichlet head input)

    # --- conv1 (merged main|zd) as a single matmul + folded BN2d + ReLU ------
    patches = patches_ref[0]                                   # (4*P, kk*kk*C_in)
    y1 = jnp.dot(patches, w1_ref[...], preferred_element_type=jnp.float32)
    y1 = jnp.maximum(y1 * s1_ref[...] + t1_ref[...], 0.0)      # (4*P, C1)

    # --- 2x2/stride-2 max-pool: elementwise max of the 4 pre-ordered phases --
    pool_ref[...] = jnp.maximum(
        jnp.maximum(y1[0 * p_rows:1 * p_rows, :], y1[1 * p_rows:2 * p_rows, :]),
        jnp.maximum(y1[2 * p_rows:3 * p_rows, :], y1[3 * p_rows:4 * p_rows, :]))
    # pool_ref row (hp * wp1 + wp) holds pooled pixel (hp, wp); tail rows = pad.

    # --- conv2 im2col built entirely in VMEM from shifted row windows --------
    for ki in range(kk):
        for kj in range(kk):
            t = ki * kk + kj
            for h2 in range(ho2):
                r0 = (h2 * stride + ki) * wp1 + kj
                if stride == 1:
                    win = pool_ref[r0:r0 + wo2, :]              # (wo2, C1)
                else:
                    win = jnp.concatenate(
                        [pool_ref[r0 + w2 * stride:r0 + w2 * stride + 1, :]
                         for w2 in range(wo2)], axis=0)
                patch2_ref[h2 * wo2:(h2 + 1) * wo2, t * c1:(t + 1) * c1] = win

    # --- conv2 (merged, block weight) + folded BN2d + ReLU -------------------
    y2 = jnp.dot(patch2_ref[...], w2_ref[...],
                 preferred_element_type=jnp.float32)
    y2 = jnp.maximum(y2 * s2_ref[...] + t2_ref[...], 0.0)       # (ho2*wo2, C2)

    # --- MaxPool2d(2,2) #2 + flatten: spatial here is 2x2 -> 1x1 -------------
    flat = jnp.max(y2, axis=0, keepdims=True)                   # (1, C2)

    # --- Linear + BN1d + ReLU (block-diagonal merged main|zd weight) ---------
    h = jnp.dot(flat, wd_ref[...], preferred_element_type=jnp.float32)
    h = jnp.maximum(h * sd_ref[...] + td_ref[...], 0.0)         # (1, 2*img_h)

    # --- EncoderH2Dirichlet: alphas = exp(BN1d(Linear(h_main))) --------------
    a = jnp.dot(h[:, :img_h], dw_ref[...], preferred_element_type=jnp.float32)
    alphas = jnp.exp(a * ds_ref[...] + dt_ref[...])             # (1, num_topics)

    out_ref[0, :, :img2] = h
    out_ref[0, :, img2:] = alphas


# --------------------------------------------------------------------------
# Kernel B: DenseNet(topic) + concat(h_img, h_topic) + LSEncoderDense + rsample
# --------------------------------------------------------------------------
def _topic_zd_kernel(topic_ref, himg_ref, w1_ref, b1_ref, w2_ref, b2_ref,
                     wls_ref, bls_ref, eps_ref, out_ref, *, zd_dim):
    """out = [loc | scale | z] with z = loc + scale * eps (Normal rsample)."""
    # DenseNet (Dropout = identity in eval): Linear-ReLU-Linear-ReLU
    h1 = jnp.maximum(
        jnp.dot(topic_ref[...], w1_ref[...], preferred_element_type=jnp.float32)
        + b1_ref[...], 0.0)
    h_topic = jnp.maximum(
        jnp.dot(h1, w2_ref[...], preferred_element_type=jnp.float32)
        + b2_ref[...], 0.0)
    # LSEncoderDense with loc|scale weights fused into a single matmul
    h_cat = jnp.concatenate([himg_ref[...], h_topic], axis=1)
    y = jnp.dot(h_cat, wls_ref[...], preferred_element_type=jnp.float32) \
        + bls_ref[...]
    loc = y[:, :zd_dim]
    raw = y[:, zd_dim:]
    # numerically stable softplus + 1e-7
    scale = jnp.maximum(raw, 0.0) + jnp.log1p(jnp.exp(-jnp.abs(raw))) + 1e-7
    out_ref[:, :zd_dim] = loc
    out_ref[:, zd_dim:2 * zd_dim] = scale
    out_ref[:, 2 * zd_dim:] = loc + scale * eps_ref[...]


# --------------------------------------------------------------------------
# Wrappers
# --------------------------------------------------------------------------
def _rep_spec(shape):
    """Full-array block, same block every grid step (weights stay VMEM-resident)."""
    return pl.BlockSpec(shape, lambda i: (0,) * len(shape))


def conv1_patches_pool_ordered(x_nhwc, kk, stride):
    """im2col for conv1 with rows grouped by 2x2-pool phase.

    Feature order is (ki, kj, c_in); for real torch weights this corresponds to
    conv.weight.permute(2, 3, 1, 0).reshape(KH*KW*C_in, C_out).
    Rows: index = phase * P + hp * Wp + wp with phase = (ho%2)*2 + wo%2 and
    P = Hp*Wp rounded up to a multiple of 8 (padded rows are never consumed).
    """
    n, h, w, c = x_nhwc.shape
    ho = (h - kk) // stride + 1
    wo = (w - kk) // stride + 1
    assert ho % 2 == 0 and wo % 2 == 0, "conv1 output must be 2x2-poolable"
    cols = [x_nhwc[:, ki:ki + stride * (ho - 1) + 1:stride,
                   kj:kj + stride * (wo - 1) + 1:stride, :]
            for ki in range(kk) for kj in range(kk)]
    pat = jnp.concatenate(cols, axis=-1)                  # (n, ho, wo, kk*kk*c)
    hp, wp = ho // 2, wo // 2
    f = kk * kk * c
    pat = pat.reshape(n, hp, 2, wp, 2, f).transpose(0, 2, 4, 1, 3, 5)
    pat = pat.reshape(n, 4, hp * wp, f)
    p_rows = pl.cdiv(hp * wp, 8) * 8
    if p_rows != hp * wp:
        pat = jnp.pad(pat, ((0, 0), (0, 0), (0, p_rows - hp * wp), (0, 0)))
    return pat.reshape(n, 4 * p_rows, f), hp, wp


def fused_conv_branches(x_nhwc, p, conv_stride, kk=5):
    """Both NetConvDense branches + Dirichlet head in a single pallas_call."""
    n = x_nhwc.shape[0]
    patches, hp1, wp1 = conv1_patches_pool_ordered(x_nhwc, kk, conv_stride)
    p_rows = patches.shape[1] // 4
    c1m = p["w1"].shape[1]                       # merged conv1 channels
    ho2 = (hp1 - kk) // conv_stride + 1
    wo2 = (wp1 - kk) // conv_stride + 1
    img_h = p["dir_w"].shape[0]
    n_topics = p["dir_w"].shape[1]
    width = p["wd"].shape[1] + n_topics          # 2*img_h + num_topics

    out = pl.pallas_call(
        functools.partial(_fused_branch_kernel, kk=kk, stride=conv_stride,
                          hp1=hp1, wp1=wp1),
        out_shape=jax.ShapeDtypeStruct((n, 1, width), jnp.float32),
        grid=(n,),
        in_specs=[pl.BlockSpec((1,) + patches.shape[1:], lambda i: (i, 0, 0)),
                  _rep_spec(p["w1"].shape), _rep_spec(p["s1"].shape),
                  _rep_spec(p["t1"].shape),
                  _rep_spec(p["w2"].shape), _rep_spec(p["s2"].shape),
                  _rep_spec(p["t2"].shape),
                  _rep_spec(p["wd"].shape), _rep_spec(p["sd"].shape),
                  _rep_spec(p["td"].shape),
                  _rep_spec(p["dir_w"].shape), _rep_spec(p["dir_s"].shape),
                  _rep_spec(p["dir_t"].shape)],
        out_specs=pl.BlockSpec((1, 1, width), lambda i: (i, 0, 0)),
        scratch_shapes=[pltpu.VMEM((p_rows, c1m), jnp.float32),
                        pltpu.VMEM((ho2 * wo2, kk * kk * c1m), jnp.float32)],
        compiler_params=pltpu.CompilerParams(
            dimension_semantics=("parallel",)),
    )(patches, p["w1"], p["s1"], p["t1"], p["w2"], p["s2"], p["t2"],
      p["wd"], p["sd"], p["td"], p["dir_w"], p["dir_s"], p["dir_t"])

    out = out.reshape(n, width)
    # columns [:img_h] (h_img_dir) feed only the in-kernel Dirichlet head.
    h_img = out[:, img_h:2 * img_h]
    alphas = out[:, 2 * img_h:]
    return h_img, alphas


def topic_img_to_zd(topic_q, h_img, p, eps):
    n = topic_q.shape[0]
    zd = eps.shape[1]
    out = pl.pallas_call(
        functools.partial(_topic_zd_kernel, zd_dim=zd),
        out_shape=jax.ShapeDtypeStruct((n, 3 * zd), jnp.float32),
        grid=(1,),
        in_specs=[_rep_spec(topic_q.shape), _rep_spec(h_img.shape),
                  _rep_spec(p["dn_w1"].shape), _rep_spec(p["dn_b1"].shape),
                  _rep_spec(p["dn_w2"].shape), _rep_spec(p["dn_b2"].shape),
                  _rep_spec(p["ls_w"].shape), _rep_spec(p["ls_b"].shape),
                  _rep_spec(eps.shape)],
        out_specs=_rep_spec((n, 3 * zd)),
    )(topic_q, h_img, p["dn_w1"], p["dn_b1"], p["dn_w2"], p["dn_b2"],
      p["ls_w"], p["ls_b"], eps)
    return out[:, :zd], out[:, zd:2 * zd], out[:, 2 * zd:]


# --------------------------------------------------------------------------
# Parameter construction (deterministic, synthetic, eval-mode BN folded)
# --------------------------------------------------------------------------
_BN_EPS = 1e-5
_BN_SCALE = float(1.0 / (1.0 + _BN_EPS) ** 0.5)   # gamma=1, running_var=1


def _w(key, shape, std=0.05):
    return (std * jax.random.normal(key, shape)).astype(jnp.float32)


def make_params(key, i_c, i_h, i_w, num_topics, zd_dim, topic_h_dim, img_h_dim,
                conv_stride=1, kk=5, c1=32, c2=64, dense_hidden=4096):
    # conv geometry (demo: 16 -conv5-> 12 -pool-> 6 -conv5-> 2 -pool-> 1)
    ho1 = (i_h - kk) // conv_stride + 1
    wo1 = (i_w - kk) // conv_stride + 1
    hp1, wp1 = ho1 // 2, wo1 // 2
    ho2 = (hp1 - kk) // conv_stride + 1
    wo2 = (wp1 - kk) // conv_stride + 1
    assert ho1 % 2 == 0 and wo1 % 2 == 0
    assert ho2 == 2 and wo2 == 2, "conv2 output must be 2x2 (-> 1x1 after pool)"
    hdim = c2          # per-branch flatten size: c2 * 1 * 1

    ks = jax.random.split(key, 18)
    bn = lambda m: jnp.full((1, m), _BN_SCALE, jnp.float32)

    # conv1: branches merged along output channels [main | zd]; rows = (ki,kj,c)
    w1 = jnp.concatenate([_w(ks[0], (kk * kk * i_c, c1)),
                          _w(ks[1], (kk * kk * i_c, c1))], axis=1)
    # conv2: per-tap block weight — each branch only reads its own conv1 channels
    w2m = _w(ks[2], (kk * kk, c1, c2))
    w2z = _w(ks[3], (kk * kk, c1, c2))
    w2 = jnp.zeros((kk * kk, 2 * c1, 2 * c2), jnp.float32)
    w2 = w2.at[:, :c1, :c2].set(w2m).at[:, c1:, c2:].set(w2z)
    w2 = w2.reshape(kk * kk * 2 * c1, 2 * c2)
    # dense (hdim -> img_h) per branch, block-diagonal after the channel merge
    wd = jnp.zeros((2 * hdim, 2 * img_h_dim), jnp.float32)
    wd = wd.at[:hdim, :img_h_dim].set(_w(ks[4], (hdim, img_h_dim)))
    wd = wd.at[hdim:, img_h_dim:].set(_w(ks[5], (hdim, img_h_dim)))
    bd = jnp.concatenate([_w(ks[6], (img_h_dim,)), _w(ks[7], (img_h_dim,))])

    params = {
        "w1": w1, "s1": bn(2 * c1), "t1": jnp.zeros((1, 2 * c1), jnp.float32),
        "w2": w2, "s2": bn(2 * c2), "t2": jnp.zeros((1, 2 * c2), jnp.float32),
        "wd": wd, "sd": bn(2 * img_h_dim),
        "td": (_BN_SCALE * bd).reshape(1, -1),     # Linear bias folded through BN1d
        # EncoderH2Dirichlet: Linear(img_h -> num_topics) + BN1d (exp in-kernel)
        "dir_w": _w(ks[8], (img_h_dim, num_topics)),
        "dir_s": bn(num_topics),
        "dir_t": (_BN_SCALE * _w(ks[9], (num_topics,))).reshape(1, -1),
        # DenseNet(topic): (Dropout=id) Linear-ReLU-(Dropout=id)-Linear-ReLU
        "dn_w1": _w(ks[10], (num_topics, dense_hidden)),
        "dn_b1": _w(ks[11], (dense_hidden,)).reshape(1, -1),
        "dn_w2": _w(ks[12], (dense_hidden, topic_h_dim)),
        "dn_b2": _w(ks[13], (topic_h_dim,)).reshape(1, -1),
        # LSEncoderDense: loc|scale weights fused into one (k, 2*zd) matrix
        "ls_w": jnp.concatenate([_w(ks[14], (img_h_dim + topic_h_dim, zd_dim)),
                                 _w(ks[15], (img_h_dim + topic_h_dim, zd_dim))],
                                axis=1),
        "ls_b": jnp.concatenate([_w(ks[16], (zd_dim,)),
                                 _w(ks[17], (zd_dim,))]).reshape(1, -1),
    }
    return params


# --------------------------------------------------------------------------
# Full forward:  x -> (q_topic, topic_q, q_zd, zd_q)
# --------------------------------------------------------------------------
def encoder_img2topic_dir_zd(x, params, key, conv_stride=1):
    n = x.shape[0]
    zd_dim = params["ls_w"].shape[1] // 2
    k_dir, k_norm = jax.random.split(key)

    # channels-last so channels map to the lane axis inside the kernel
    x_nhwc = jnp.transpose(x, (0, 2, 3, 1))
    h_img, alphas = fused_conv_branches(x_nhwc, params, conv_stride)

    # h2dir: q_topic = Dirichlet(alphas); topic_q ~ q_topic
    # TODO(synk): Dirichlet rsample (gamma sampling) has no Pallas primitive; use jax.random.
    topic_q = jax.random.dirichlet(k_dir, alphas).astype(jnp.float32)
    q_topic = alphas                     # Dirichlet concentration parameters

    # imgtopic2zd: DenseNet(topic) + concat + LSEncoderDense + reparam sample
    eps = jax.random.normal(k_norm, (n, zd_dim), jnp.float32)
    loc, scale, zd_q = topic_img_to_zd(topic_q, h_img, params, eps)
    q_zd = (loc, scale)                  # Normal(loc, scale)
    return q_topic, topic_q, q_zd, zd_q


# --------------------------------------------------------------------------
if __name__ == "__main__":
    N, I_C, I_H, I_W = 2, 3, 16, 16
    NUM_TOPICS, ZD_DIM, TOPIC_H_DIM, IMG_H_DIM = 8, 8, 16, 32
    CONV_STRIDE = 1   # 16 -conv5-> 12 -pool-> 6 -conv5-> 2 -pool-> 1

    root = jax.random.PRNGKey(0)
    k_param, k_x, k_sample = jax.random.split(root, 3)

    params = make_params(k_param, I_C, I_H, I_W, NUM_TOPICS, ZD_DIM,
                         TOPIC_H_DIM, IMG_H_DIM, conv_stride=CONV_STRIDE)
    x = jax.random.normal(k_x, (N, I_C, I_H, I_W), jnp.float32)

    q_topic, topic_q, q_zd, zd_q = encoder_img2topic_dir_zd(
        x, params, k_sample, conv_stride=CONV_STRIDE)
    jax.block_until_ready((q_topic, topic_q, q_zd, zd_q))

    assert q_topic.shape == (N, NUM_TOPICS)
    assert topic_q.shape == (N, NUM_TOPICS)
    assert q_zd[0].shape == (N, ZD_DIM) and q_zd[1].shape == (N, ZD_DIM)
    assert zd_q.shape == (N, ZD_DIM)
    assert bool(jnp.all(jnp.isfinite(zd_q)))
    assert bool(jnp.all(q_zd[1] > 0.0))
    assert bool(jnp.all(jnp.abs(topic_q.sum(axis=1) - 1.0) < 1e-3))
    print("KERNEL_OK")
</pallas_src>

<mosaic_0001>
module attributes {stable_mosaic.version = 11 : i64} {
  func.func @_fused_branch_kernel(%arg0: i32, %arg1: memref<1x160x75xf32, #tpu.memory_space<vmem>>, %arg2: memref<75x64xf32, #tpu.memory_space<vmem>>, %arg3: memref<1x64xf32, #tpu.memory_space<vmem>>, %arg4: memref<1x64xf32, #tpu.memory_space<vmem>>, %arg5: memref<1600x128xf32, #tpu.memory_space<vmem>>, %arg6: memref<1x128xf32, #tpu.memory_space<vmem>>, %arg7: memref<1x128xf32, #tpu.memory_space<vmem>>, %arg8: memref<128x64xf32, #tpu.memory_space<vmem>>, %arg9: memref<1x64xf32, #tpu.memory_space<vmem>>, %arg10: memref<1x64xf32, #tpu.memory_space<vmem>>, %arg11: memref<32x8xf32, #tpu.memory_space<vmem>>, %arg12: memref<1x8xf32, #tpu.memory_space<vmem>>, %arg13: memref<1x8xf32, #tpu.memory_space<vmem>>, %arg14: memref<1x1x72xf32, #tpu.memory_space<vmem>>, %arg15: memref<40x64xf32, #tpu.memory_space<vmem>>, %arg16: memref<4x1600xf32, #tpu.memory_space<vmem>>) attributes {dimension_semantics = [#tpu.dimension_semantics<parallel>], iteration_bounds = array<i64: 2>, scalar_prefetch = 0 : i64, scratch_operands = 2 : i64, tpu.core_type = #tpu.core_type<tc>, window_params = [{transform_indices = @transform_0, window_bounds = array<i64: 1, 160, 75>}, {pipeline_mode = #tpu.pipeline_mode<synchronous>, transform_indices = @transform_1, window_bounds = array<i64: 75, 64>}, {pipeline_mode = #tpu.pipeline_mode<synchronous>, transform_indices = @transform_2, window_bounds = array<i64: 1, 64>}, {pipeline_mode = #tpu.pipeline_mode<synchronous>, transform_indices = @transform_3, window_bounds = array<i64: 1, 64>}, {pipeline_mode = #tpu.pipeline_mode<synchronous>, transform_indices = @transform_4, window_bounds = array<i64: 1600, 128>}, {pipeline_mode = #tpu.pipeline_mode<synchronous>, transform_indices = @transform_5, window_bounds = array<i64: 1, 128>}, {pipeline_mode = #tpu.pipeline_mode<synchronous>, transform_indices = @transform_6, window_bounds = array<i64: 1, 128>}, {pipeline_mode = #tpu.pipeline_mode<synchronous>, transform_indices = @transform_7, window_bounds = array<i64: 128, 64>}, {pipeline_mode = #tpu.pipeline_mode<synchronous>, transform_indices = @transform_8, window_bounds = array<i64: 1, 64>}, {pipeline_mode = #tpu.pipeline_mode<synchronous>, transform_indices = @transform_9, window_bounds = array<i64: 1, 64>}, {pipeline_mode = #tpu.pipeline_mode<synchronous>, transform_indices = @transform_10, window_bounds = array<i64: 32, 8>}, {pipeline_mode = #tpu.pipeline_mode<synchronous>, transform_indices = @transform_11, window_bounds = array<i64: 1, 8>}, {pipeline_mode = #tpu.pipeline_mode<synchronous>, transform_indices = @transform_12, window_bounds = array<i64: 1, 8>}, {transform_indices = @transform_13, window_bounds = array<i64: 1, 1, 72>}]} {
    %c0 = arith.constant 0 : index
    %c0_0 = arith.constant 0 : index
    %c0_1 = arith.constant 0 : index
    %0 = vector.load %arg1[%c0, %c0_0, %c0_1] : memref<1x160x75xf32, #tpu.memory_space<vmem>>, vector<1x160x75xf32>
    %1 = vector.shape_cast %0 : vector<1x160x75xf32> to vector<160x75xf32>
    %c0_2 = arith.constant 0 : index
    %c0_3 = arith.constant 0 : index
    %2 = vector.load %arg2[%c0_2, %c0_3] : memref<75x64xf32, #tpu.memory_space<vmem>>, vector<75x64xf32>
    %cst = arith.constant dense<0.000000e+00> : vector<160x64xf32>
    %3 = tpu.matmul %1, %2, %cst {dimension_numbers = #tpu.dot_dimension_numbers<[1], [0], [0], [1], [0, 0, 1, 1], [], []>} : vector<160x75xf32>, vector<75x64xf32>, vector<160x64xf32> -> vector<160x64xf32>
    %c0_4 = arith.constant 0 : index
    %c0_5 = arith.constant 0 : index
    %4 = vector.load %arg3[%c0_4, %c0_5] : memref<1x64xf32, #tpu.memory_space<vmem>>, vector<1x64xf32>
    %5 = vector.broadcast %4 : vector<1x64xf32> to vector<160x64xf32>
    %6 = arith.mulf %3, %5 : vector<160x64xf32>
    %c0_6 = arith.constant 0 : index
    %c0_7 = arith.constant 0 : index
    %7 = vector.load %arg4[%c0_6, %c0_7] : memref<1x64xf32, #tpu.memory_space<vmem>>, vector<1x64xf32>
    %8 = vector.broadcast %7 : vector<1x64xf32> to vector<160x64xf32>
    %9 = arith.addf %6, %8 : vector<160x64xf32>
    %cst_8 = arith.constant 0.000000e+00 : f32
    %10 = vector.broadcast %cst_8 : f32 to vector<160x64xf32>
    %11 = arith.maximumf %9, %10 : vector<160x64xf32>
    %12 = vector.extract_strided_slice %11 {offsets = [0, 0], sizes = [40, 64], strides = [1, 1]} : vector<160x64xf32> to vector<40x64xf32>
    %13 = vector.extract_strided_slice %11 {offsets = [40, 0], sizes = [40, 64], strides = [1, 1]} : vector<160x64xf32> to vector<40x64xf32>
    %14 = arith.maximumf %12, %13 : vector<40x64xf32>
    %15 = vector.extract_strided_slice %11 {offsets = [80, 0], sizes = [40, 64], strides = [1, 1]} : vector<160x64xf32> to vector<40x64xf32>
    %16 = vector.extract_strided_slice %11 {offsets = [120, 0], sizes = [40, 64], strides = [1, 1]} : vector<160x64xf32> to vector<40x64xf32>
    %17 = arith.maximumf %15, %16 : vector<40x64xf32>
    %18 = arith.maximumf %14, %17 : vector<40x64xf32>
    %c0_9 = arith.constant 0 : index
    %c0_10 = arith.constant 0 : index
    %19 = vector.load %arg15[%c0_9, %c0_10] : memref<40x64xf32, #tpu.memory_space<vmem>>, vector<40x64xf32>
    tpu.vector_store %arg15[%c0_9, %c0_10], %18 {strides = array<i32>} : memref<40x64xf32, #tpu.memory_space<vmem>>, vector<40x64xf32>,
    %c0_11 = arith.constant 0 : index
    %c0_12 = arith.constant 0 : index
    %20 = vector.load %arg15[%c0_11, %c0_12] : memref<40x64xf32, #tpu.memory_space<vmem>>, vector<2x64xf32>
    %c0_13 = arith.constant 0 : index
    %c0_14 = arith.constant 0 : index
    %21 = vector.load %arg16[%c0_13, %c0_14] : memref<4x1600xf32, #tpu.memory_space<vmem>>, vector<2x64xf32>
    tpu.vector_store %arg16[%c0_13, %c0_14], %20 {strides = array<i32>} : memref<4x1600xf32, #tpu.memory_space<vmem>>, vector<2x64xf32>,
    %c6 = arith.constant 6 : index
    %c0_15 = arith.constant 0 : index
    %22 = vector.load %arg15[%c6, %c0_15] : memref<40x64xf32, #tpu.memory_space<vmem>>, vector<2x64xf32>
    %c2 = arith.constant 2 : index
    %c0_16 = arith.constant 0 : index
    %23 = vector.load %arg16[%c2, %c0_16] : memref<4x1600xf32, #tpu.memory_space<vmem>>, vector<2x64xf32>
    tpu.vector_store %arg16[%c2, %c0_16], %22 {strides = array<i32>} : memref<4x1600xf32, #tpu.memory_space<vmem>>, vector<2x64xf32>,
    %c1 = arith.constant 1 : index
    %c0_17 = arith.constant 0 : index
    %24 = vector.load %arg15[%c1, %c0_17] : memref<40x64xf32, #tpu.memory_space<vmem>>, vector<2x64xf32>
    %c0_18 = arith.constant 0 : index
    %c64 = arith.constant 64 : index
    %25 = vector.load %arg16[%c0_18, %c64] : memref<4x1600xf32, #tpu.memory_space<vmem>>, vector<2x64xf32>
    tpu.vector_store %arg16[%c0_18, %c64], %24 {strides = array<i32>} : memref<4x1600xf32, #tpu.memory_space<vmem>>, vector<2x64xf32>,
    %c7 = arith.constant 7 : index
    %c0_19 = arith.constant 0 : index
    %26 = vector.load %arg15[%c7, %c0_19] : memref<40x64xf32, #tpu.memory_space<vmem>>, vector<2x64xf32>
    %c2_20 = arith.constant 2 : index
    %c64_21 = arith.constant 64 : index
    %27 = vector.load %arg16[%c2_20, %c64_21] : memref<4x1600xf32, #tpu.memory_space<vmem>>, vector<2x64xf32>
    tpu.vector_store %arg16[%c2_20, %c64_21], %26 {strides = array<i32>} : memref<4x1600xf32, #tpu.memory_space<vmem>>, vector<2x64xf32>,
    %c2_22 = arith.constant 2 : index
    %c0_23 = arith.constant 0 : index
    %28 = vector.load %arg15[%c2_22, %c0_23] : memref<40x64xf32, #tpu.memory_space<vmem>>, vector<2x64xf32>
    %c0_24 = arith.constant 0 : index
    %c128 = arith.constant 128 : index
    %29 = vector.load %arg16[%c0_24, %c128] : memref<4x1600xf32, #tpu.memory_space<vmem>>, vector<2x64xf32>
    tpu.vector_store %arg16[%c0_24, %c128], %28 {strides = array<i32>} : memref<4x1600xf32, #tpu.memory_space<vmem>>, vector<2x64xf32>,
    %c8 = arith.constant 8 : index
    %c0_25 = arith.constant 0 : index
    %30 = vector.load %arg15[%c8, %c0_25] : memref<40x64xf32, #tpu.memory_space<vmem>>, vector<2x64xf32>
    %c2_26 = arith.constant 2 : index
    %c128_27 = arith.constant 128 : index
    %31 = vector.load %arg16[%c2_26, %c128_27] : memref<4x1600xf32, #tpu.memory_space<vmem>>, vector<2x64xf32>
    tpu.vector_store %arg16[%c2_26, %c128_27], %30 {strides = array<i32>} : memref<4x1600xf32, #tpu.memory_space<vmem>>, vector<2x64xf32>,
    %c3 = arith.constant 3 : index
    %c0_28 = arith.constant 0 : index
    %32 = vector.load %arg15[%c3, %c0_28] : memref<40x64xf32, #tpu.memory_space<vmem>>, vector<2x64xf32>
    %c0_29 = arith.constant 0 : index
    %c192 = arith.constant 192 : index
    %33 = vector.load %arg16[%c0_29, %c192] : memref<4x1600xf32, #tpu.memory_space<vmem>>, vector<2x64xf32>
    tpu.vector_store %arg16[%c0_29, %c192], %32 {strides = array<i32>} : memref<4x1600xf32, #tpu.memory_space<vmem>>, vector<2x64xf32>,
    %c9 = arith.constant 9 : index
    %c0_30 = arith.constant 0 : index
    %34 = vector.load %arg15[%c9, %c0_30] : memref<40x64xf32, #tpu.memory_space<vmem>>, vector<2x64xf32>
    %c2_31 = arith.constant 2 : index
    %c192_32 = arith.constant 192 : index
    %35 = vector.load %arg16[%c2_31, %c192_32] : memref<4x1600xf32, #tpu.memory_space<vmem>>, vector<2x64xf32>
    tpu.vector_store %arg16[%c2_31, %c192_32], %34 {strides = array<i32>} : memref<4x1600xf32, #tpu.memory_space<vmem>>, vector<2x64xf32>,
    %c4 = arith.constant 4 : index
    %c0_33 = arith.constant 0 : index
    %36 = vector.load %arg15[%c4, %c0_33] : memref<40x64xf32, #tpu.memory_space<vmem>>, vector<2x64xf32>
    %c0_34 = arith.constant 0 : index
    %c256 = arith.constant 256 : index
    %37 = vector.load %arg16[%c0_34, %c256] : memref<4x1600xf32, #tpu.memory_space<vmem>>, vector<2x64xf32>
    tpu.vector_store %arg16[%c0_34, %c256], %36 {strides = array<i32>} : memref<4x1600xf32, #tpu.memory_space<vmem>>, vector<2x64xf32>,
    %c10 = arith.constant 10 : index
    %c0_35 = arith.constant 0 : index
    %38 = vector.load %arg15[%c10, %c0_35] : memref<40x64xf32, #tpu.memory_space<vmem>>, vector<2x64xf32>
    %c2_36 = arith.constant 2 : index
    %c256_37 = arith.constant 256 : index
    %39 = vector.load %arg16[%c2_36, %c256_37] : memref<4x1600xf32, #tpu.memory_space<vmem>>, vector<2x64xf32>
    tpu.vector_store %arg16[%c2_36, %c256_37], %38 {strides = array<i32>} : memref<4x1600xf32, #tpu.memory_space<vmem>>, vector<2x64xf32>,
    %c6_38 = arith.constant 6 : index
    %c0_39 = arith.constant 0 : index
    %40 = vector.load %arg15[%c6_38, %c0_39] : memref<40x64xf32, #tpu.memory_space<vmem>>, vector<2x64xf32>
    %c0_40 = arith.constant 0 : index
    %c320 = arith.constant 320 : index
    %41 = vector.load %arg16[%c0_40, %c320] : memref<4x1600xf32, #tpu.memory_space<vmem>>, vector<2x64xf32>
    tpu.vector_store %arg16[%c0_40, %c320], %40 {strides = array<i32>} : memref<4x1600xf32, #tpu.memory_space<vmem>>, vector<2x64xf32>,
    %c12 = arith.constant 12 : index
    %c0_41 = arith.constant 0 : index
    %42 = vector.load %arg15[%c12, %c0_41] : memref<40x64xf32, #tpu.memory_space<vmem>>, vector<2x64xf32>
    %c2_42 = arith.constant 2 : index
    %c320_43 = arith.constant 320 : index
    %43 = vector.load %arg16[%c2_42, %c320_43] : memref<4x1600xf32, #tpu.memory_space<vmem>>, vector<2x64xf32>
    tpu.vector_store %arg16[%c2_42, %c320_43], %42 {strides = array<i32>} : memref<4x1600xf32, #tpu.memory_space<vmem>>, vector<2x64xf32>,
    %c7_44 = arith.constant 7 : index
    %c0_45 = arith.constant 0 : index
    %44 = vector.load %arg15[%c7_44, %c0_45] : memref<40x64xf32, #tpu.memory_space<vmem>>, vector<2x64xf32>
    %c0_46 = arith.constant 0 : index
    %c384 = arith.constant 384 : index
    %45 = vector.load %arg16[%c0_46, %c384] : memref<4x1600xf32, #tpu.memory_space<vmem>>, vector<2x64xf32>
    tpu.vector_store %arg16[%c0_46, %c384], %44 {strides = array<i32>} : memref<4x1600xf32, #tpu.memory_space<vmem>>, vector<2x64xf32>,
    %c13 = arith.constant 13 : index
    %c0_47 = arith.constant 0 : index
    %46 = vector.load %arg15[%c13, %c0_47] : memref<40x64xf32, #tpu.memory_space<vmem>>, vector<2x64xf32>
    %c2_48 = arith.constant 2 : index
    %c384_49 = arith.constant 384 : index
    %47 = vector.load %arg16[%c2_48, %c384_49] : memref<4x1600xf32, #tpu.memory_space<vmem>>, vector<2x64xf32>
    tpu.vector_store %arg16[%c2_48, %c384_49], %46 {strides = array<i32>} : memref<4x1600xf32, #tpu.memory_space<vmem>>, vector<2x64xf32>,
    %c8_50 = arith.constant 8 : index
    %c0_51 = arith.constant 0 : index
    %48 = vector.load %arg15[%c8_50, %c0_51] : memref<40x64xf32, #tpu.memory_space<vmem>>, vector<2x64xf32>
    %c0_52 = arith.constant 0 : index
    %c448 = arith.constant 448 : index
    %49 = vector.load %arg16[%c0_52, %c448] : memref<4x1600xf32, #tpu.memory_space<vmem>>, vector<2x64xf32>
    tpu.vector_store %arg16[%c0_52, %c448], %48 {strides = array<i32>} : memref<4x1600xf32, #tpu.memory_space<vmem>>, vector<2x64xf32>,
    %c14 = arith.constant 14 : index
    %c0_53 = arith.constant 0 : index
    %50 = vector.load %arg15[%c14, %c0_53] : memref<40x64xf32, #tpu.memory_space<vmem>>, vector<2x64xf32>
    %c2_54 = arith.constant 2 : index
    %c448_55 = arith.constant 448 : index
    %51 = vector.load %arg16[%c2_54, %c448_55] : memref<4x1600xf32, #tpu.memory_space<vmem>>, vector<2x64xf32>
    tpu.vector_store %arg16[%c2_54, %c448_55], %50 {strides = array<i32>} : memref<4x1600xf32, #tpu.memory_space<vmem>>, vector<2x64xf32>,
    %c9_56 = arith.constant 9 : index
    %c0_57 = arith.constant 0 : index
    %52 = vector.load %arg15[%c9_56, %c0_57] : memref<40x64xf32, #tpu.memory_space<vmem>>, vector<2x64xf32>
    %c0_58 = arith.constant 0 : index
    %c512 = arith.constant 512 : index
    %53 = vector.load %arg16[%c0_58, %c512] : memref<4x1600xf32, #tpu.memory_space<vmem>>, vector<2x64xf32>
    tpu.vector_store %arg16[%c0_58, %c512], %52 {strides = array<i32>} : memref<4x1600xf32, #tpu.memory_space<vmem>>, vector<2x64xf32>,
    %c15 = arith.constant 15 : index
    %c0_59 = arith.constant 0 : index
    %54 = vector.load %arg15[%c15, %c0_59] : memref<40x64xf32, #tpu.memory_space<vmem>>, vector<2x64xf32>
    %c2_60 = arith.constant 2 : index
    %c512_61 = arith.constant 512 : index
    %55 = vector.load %arg16[%c2_60, %c512_61] : memref<4x1600xf32, #tpu.memory_space<vmem>>, vector<2x64xf32>
    tpu.vector_store %arg16[%c2_60, %c512_61], %54 {strides = array<i32>} : memref<4x1600xf32, #tpu.memory_space<vmem>>, vector<2x64xf32>,
    %c10_62 = arith.constant 10 : index
    %c0_63 = arith.constant 0 : index
    %56 = vector.load %arg15[%c10_62, %c0_63] : memref<40x64xf32, #tpu.memory_space<vmem>>, vector<2x64xf32>
    %c0_64 = arith.constant 0 : index
    %c576 = arith.constant 576 : index
    %57 = vector.load %arg16[%c0_64, %c576] : memref<4x1600xf32, #tpu.memory_space<vmem>>, vector<2x64xf32>
    tpu.vector_store %arg16[%c0_64, %c576], %56 {strides = array<i32>} : memref<4x1600xf32, #tpu.memory_space<vmem>>, vector<2x64xf32>,
    %c16 = arith.constant 16 : index
    %c0_65 = arith.constant 0 : index
    %58 = vector.load %arg15[%c16, %c0_65] : memref<40x64xf32, #tpu.memory_space<vmem>>, vector<2x64xf32>
    %c2_66 = arith.constant 2 : index
    %c576_67 = arith.constant 576 : index
    %59 = vector.load %arg16[%c2_66, %c576_67] : memref<4x1600xf32, #tpu.memory_space<vmem>>, vector<2x64xf32>
    tpu.vector_store %arg16[%c2_66, %c576_67], %58 {strides = array<i32>} : memref<4x1600xf32, #tpu.memory_space<vmem>>, vector<2x64xf32>,
    %c12_68 = arith.constant 12 : index
    %c0_69 = arith.constant 0 : index
    %60 = vector.load %arg15[%c12_68, %c0_69] : memref<40x64xf32, #tpu.memory_space<vmem>>, vector<2x64xf32>
    %c0_70 = arith.constant 0 : index
    %c640 = arith.constant 640 : index
    %61 = vector.load %arg16[%c0_70, %c640] : memref<4x1600xf32, #tpu.memory_space<vmem>>, vector<2x64xf32>
    tpu.vector_store %arg16[%c0_70, %c640], %60 {strides = array<i32>} : memref<4x1600xf32, #tpu.memory_space<vmem>>, vector<2x64xf32>,
    %c18 = arith.constant 18 : index
    %c0_71 = arith.constant 0 : index
    %62 = vector.load %arg15[%c18, %c0_71] : memref<40x64xf32, #tpu.memory_space<vmem>>, vector<2x64xf32>
    %c2_72 = arith.constant 2 : index
    %c640_73 = arith.constant 640 : index
    %63 = vector.load %arg16[%c2_72, %c640_73] : memref<4x1600xf32, #tpu.memory_space<vmem>>, vector<2x64xf32>
    tpu.vector_store %arg16[%c2_72, %c640_73], %62 {strides = array<i32>} : memref<4x1600xf32, #tpu.memory_space<vmem>>, vector<2x64xf32>,
    %c13_74 = arith.constant 13 : index
    %c0_75 = arith.constant 0 : index
    %64 = vector.load %arg15[%c13_74, %c0_75] : memref<40x64xf32, #tpu.memory_space<vmem>>, vector<2x64xf32>
    %c0_76 = arith.constant 0 : index
    %c704 = arith.constant 704 : index
    %65 = vector.load %arg16[%c0_76, %c704] : memref<4x1600xf32, #tpu.memory_space<vmem>>, vector<2x64xf32>
    tpu.vector_store %arg16[%c0_76, %c704], %64 {strides = array<i32>} : memref<4x1600xf32, #tpu.memory_space<vmem>>, vector<2x64xf32>,
    %c19 = arith.constant 19 : index
    %c0_77 = arith.constant 0 : index
    %66 = vector.load %arg15[%c19, %c0_77] : memref<40x64xf32, #tpu.memory_space<vmem>>, vector<2x64xf32>
    %c2_78 = arith.constant 2 : index
    %c704_79 = arith.constant 704 : index
    %67 = vector.load %arg16[%c2_78, %c704_79] : memref<4x1600xf32, #tpu.memory_space<vmem>>, vector<2x64xf32>
    tpu.vector_store %arg16[%c2_78, %c704_79], %66 {strides = array<i32>} : memref<4x1600xf32, #tpu.memory_space<vmem>>, vector<2x64xf32>,
    %c14_80 = arith.constant 14 : index
    %c0_81 = arith.constant 0 : index
    %68 = vector.load %arg15[%c14_80, %c0_81] : memref<40x64xf32, #tpu.memory_space<vmem>>, vector<2x64xf32>
    %c0_82 = arith.constant 0 : index
    %c768 = arith.constant 768 : index
    %69 = vector.load %arg16[%c0_82, %c768] : memref<4x1600xf32, #tpu.memory_space<vmem>>, vector<2x64xf32>
    tpu.vector_store %arg16[%c0_82, %c768], %68 {strides = array<i32>} : memref<4x1600xf32, #tpu.memory_space<vmem>>, vector<2x64xf32>,
    %c20 = arith.constant 20 : index
    %c0_83 = arith.constant 0 : index
    %70 = vector.load %arg15[%c20, %c0_83] : memref<40x64xf32, #tpu.memory_space<vmem>>, vector<2x64xf32>
    %c2_84 = arith.constant 2 : index
    %c768_85 = arith.constant 768 : index
    %71 = vector.load %arg16[%c2_84, %c768_85] : memref<4x1600xf32, #tpu.memory_space<vmem>>, vector<2x64xf32>
    tpu.vector_store %arg16[%c2_84, %c768_85], %70 {strides = array<i32>} : memref<4x1600xf32, #tpu.memory_space<vmem>>, vector<2x64xf32>,
    %c15_86 = arith.constant 15 : index
    %c0_87 = arith.constant 0 : index
    %72 = vector.load %arg15[%c15_86, %c0_87] : memref<40x64xf32, #tpu.memory_space<vmem>>, vector<2x64xf32>
    %c0_88 = arith.constant 0 : index
    %c832 = arith.constant 832 : index
    %73 = vector.load %arg16[%c0_88, %c832] : memref<4x1600xf32, #tpu.memory_space<vmem>>, vector<2x64xf32>
    tpu.vector_store %arg16[%c0_88, %c832], %72 {strides = array<i32>} : memref<4x1600xf32, #tpu.memory_space<vmem>>, vector<2x64xf32>,
    %c21 = arith.constant 21 : index
    %c0_89 = arith.constant 0 : index
    %74 = vector.load %arg15[%c21, %c0_89] : memref<40x64xf32, #tpu.memory_space<vmem>>, vector<2x64xf32>
    %c2_90 = arith.constant 2 : index
    %c832_91 = arith.constant 832 : index
    %75 = vector.load %arg16[%c2_90, %c832_91] : memref<4x1600xf32, #tpu.memory_space<vmem>>, vector<2x64xf32>
    tpu.vector_store %arg16[%c2_90, %c832_91], %74 {strides = array<i32>} : memref<4x1600xf32, #tpu.memory_space<vmem>>, vector<2x64xf32>,
    %c16_92 = arith.constant 16 : index
    %c0_93 = arith.constant 0 : index
    %76 = vector.load %arg15[%c16_92, %c0_93] : memref<40x64xf32, #tpu.memory_space<vmem>>, vector<2x64xf32>
    %c0_94 = arith.constant 0 : index
    %c896 = arith.constant 896 : index
    %77 = vector.load %arg16[%c0_94, %c896] : memref<4x1600xf32, #tpu.memory_space<vmem>>, vector<2x64xf32>
    tpu.vector_store %arg16[%c0_94, %c896], %76 {strides = array<i32>} : memref<4x1600xf32, #tpu.memory_space<vmem>>, vector<2x64xf32>,
    %c22 = arith.constant 22 : index
    %c0_95 = arith.constant 0 : index
    %78 = vector.load %arg15[%c22, %c0_95] : memref<40x64xf32, #tpu.memory_space<vmem>>, vector<2x64xf32>
    %c2_96 = arith.constant 2 : index
    %c896_97 = arith.constant 896 : index
    %79 = vector.load %arg16[%c2_96, %c896_97] : memref<4x1600xf32, #tpu.memory_space<vmem>>, vector<2x64xf32>
    tpu.vector_store %arg16[%c2_96, %c896_97], %78 {strides = array<i32>} : memref<4x1600xf32, #tpu.memory_space<vmem>>, vector<2x64xf32>,
    %c18_98 = arith.constant 18 : index
    %c0_99 = arith.constant 0 : index
    %80 = vector.load %arg15[%c18_98, %c0_99] : memref<40x64xf32, #tpu.memory_space<vmem>>, vector<2x64xf32>
    %c0_100 = arith.constant 0 : index
    %c960 = arith.constant 960 : index
    %81 = vector.load %arg16[%c0_100, %c960] : memref<4x1600xf32, #tpu.memory_space<vmem>>, vector<2x64xf32>
    tpu.vector_store %arg16[%c0_100, %c960], %80 {strides = array<i32>} : memref<4x1600xf32, #tpu.memory_space<vmem>>, vector<2x64xf32>,
    %c24 = arith.constant 24 : index
    %c0_101 = arith.constant 0 : index
    %82 = vector.load %arg15[%c24, %c0_101] : memref<40x64xf32, #tpu.memory_space<vmem>>, vector<2x64xf32>
    %c2_102 = arith.constant 2 : index
    %c960_103 = arith.constant 960 : index
    %83 = vector.load %arg16[%c2_102, %c960_103] : memref<4x1600xf32, #tpu.memory_space<vmem>>, vector<2x64xf32>
    tpu.vector_store %arg16[%c2_102, %c960_103], %82 {strides = array<i32>} : memref<4x1600xf32, #tpu.memory_space<vmem>>, vector<2x64xf32>,
    %c19_104 = arith.constant 19 : index
    %c0_105 = arith.constant 0 : index
    %84 = vector.load %arg15[%c19_104, %c0_105] : memref<40x64xf32, #tpu.memory_space<vmem>>, vector<2x64xf32>
    %c0_106 = arith.constant 0 : index
    %c1024 = arith.constant 1024 : index
    %85 = vector.load %arg16[%c0_106, %c1024] : memref<4x1600xf32, #tpu.memory_space<vmem>>, vector<2x64xf32>
    tpu.vector_store %arg16[%c0_106, %c1024], %84 {strides = array<i32>} : memref<4x1600xf32, #tpu.memory_space<vmem>>, vector<2x64xf32>,
    %c25 = arith.constant 25 : index
    %c0_107 = arith.constant 0 : index
    %86 = vector.load %arg15[%c25, %c0_107] : memref<40x64xf32, #tpu.memory_space<vmem>>, vector<2x64xf32>
    %c2_108 = arith.constant 2 : index
    %c1024_109 = arith.constant 1024 : index
    %87 = vector.load %arg16[%c2_108, %c1024_109] : memref<4x1600xf32, #tpu.memory_space<vmem>>, vector<2x64xf32>
    tpu.vector_store %arg16[%c2_108, %c1024_109], %86 {strides = array<i32>} : memref<4x1600xf32, #tpu.memory_space<vmem>>, vector<2x64xf32>,
    %c20_110 = arith.constant 20 : index
    %c0_111 = arith.constant 0 : index
    %88 = vector.load %arg15[%c20_110, %c0_111] : memref<40x64xf32, #tpu.memory_space<vmem>>, vector<2x64xf32>
    %c0_112 = arith.constant 0 : index
    %c1088 = arith.constant 1088 : index
    %89 = vector.load %arg16[%c0_112, %c1088] : memref<4x1600xf32, #tpu.memory_space<vmem>>, vector<2x64xf32>
    tpu.vector_store %arg16[%c0_112, %c1088], %88 {strides = array<i32>} : memref<4x1600xf32, #tpu.memory_space<vmem>>, vector<2x64xf32>,
    %c26 = arith.constant 26 : index
    %c0_113 = arith.constant 0 : index
    %90 = vector.load %arg15[%c26, %c0_113] : memref<40x64xf32, #tpu.memory_space<vmem>>, vector<2x64xf32>
    %c2_114 = arith.constant 2 : index
    %c1088_115 = arith.constant 1088 : index
    %91 = vector.load %arg16[%c2_114, %c1088_115] : memref<4x1600xf32, #tpu.memory_space<vmem>>, vector<2x64xf32>
    tpu.vector_store %arg16[%c2_114, %c1088_115], %90 {strides = array<i32>} : memref<4x1600xf32, #tpu.memory_space<vmem>>, vector<2x64xf32>,
    %c21_116 = arith.constant 21 : index
    %c0_117 = arith.constant 0 : index
    %92 = vector.load %arg15[%c21_116, %c0_117] : memref<40x64xf32, #tpu.memory_space<vmem>>, vector<2x64xf32>
    %c0_118 = arith.constant 0 : index
    %c1152 = arith.constant 1152 : index
    %93 = vector.load %arg16[%c0_118, %c1152] : memref<4x1600xf32, #tpu.memory_space<vmem>>, vector<2x64xf32>
    tpu.vector_store %arg16[%c0_118, %c1152], %92 {strides = array<i32>} : memref<4x1600xf32, #tpu.memory_space<vmem>>, vector<2x64xf32>,
    %c27 = arith.constant 27 : index
    %c0_119 = arith.constant 0 : index
    %94 = vector.load %arg15[%c27, %c0_119] : memref<40x64xf32, #tpu.memory_space<vmem>>, vector<2x64xf32>
    %c2_120 = arith.constant 2 : index
    %c1152_121 = arith.constant 1152 : index
    %95 = vector.load %arg16[%c2_120, %c1152_121] : memref<4x1600xf32, #tpu.memory_space<vmem>>, vector<2x64xf32>
    tpu.vector_store %arg16[%c2_120, %c1152_121], %94 {strides = array<i32>} : memref<4x1600xf32, #tpu.memory_space<vmem>>, vector<2x64xf32>,
    %c22_122 = arith.constant 22 : index
    %c0_123 = arith.constant 0 : index
    %96 = vector.load %arg15[%c22_122, %c0_123] : memref<40x64xf32, #tpu.memory_space<vmem>>, vector<2x64xf32>
    %c0_124 = arith.constant 0 : index
    %c1216 = arith.constant 1216 : index
    %97 = vector.load %arg16[%c0_124, %c1216] : memref<4x1600xf32, #tpu.memory_space<vmem>>, vector<2x64xf32>
    tpu.vector_store %arg16[%c0_124, %c1216], %96 {strides = array<i32>} : memref<4x1600xf32, #tpu.memory_space<vmem>>, vector<2x64xf32>,
    %c28 = arith.constant 28 : index
    %c0_125 = arith.constant 0 : index
    %98 = vector.load %arg15[%c28, %c0_125] : memref<40x64xf32, #tpu.memory_space<vmem>>, vector<2x64xf32>
    %c2_126 = arith.constant 2 : index
    %c1216_127 = arith.constant 1216 : index
    %99 = vector.load %arg16[%c2_126, %c1216_127] : memref<4x1600xf32, #tpu.memory_space<vmem>>, vector<2x64xf32>
    tpu.vector_store %arg16[%c2_126, %c1216_127], %98 {strides = array<i32>} : memref<4x1600xf32, #tpu.memory_space<vmem>>, vector<2x64xf32>,
    %c24_128 = arith.constant 24 : index
    %c0_129 = arith.constant 0 : index
    %100 = vector.load %arg15[%c24_128, %c0_129] : memref<40x64xf32, #tpu.memory_space<vmem>>, vector<2x64xf32>
    %c0_130 = arith.constant 0 : index
    %c1280 = arith.constant 1280 : index
    %101 = vector.load %arg16[%c0_130, %c1280] : memref<4x1600xf32, #tpu.memory_space<vmem>>, vector<2x64xf32>
    tpu.vector_store %arg16[%c0_130, %c1280], %100 {strides = array<i32>} : memref<4x1600xf32, #tpu.memory_space<vmem>>, vector<2x64xf32>,
    %c30 = arith.constant 30 : index
    %c0_131 = arith.constant 0 : index
    %102 = vector.load %arg15[%c30, %c0_131] : memref<40x64xf32, #tpu.memory_space<vmem>>, vector<2x64xf32>
    %c2_132 = arith.constant 2 : index
    %c1280_133 = arith.constant 1280 : index
    %103 = vector.load %arg16[%c2_132, %c1280_133] : memref<4x1600xf32, #tpu.memory_space<vmem>>, vector<2x64xf32>
    tpu.vector_store %arg16[%c2_132, %c1280_133], %102 {strides = array<i32>} : memref<4x1600xf32, #tpu.memory_space<vmem>>, vector<2x64xf32>,
    %c25_134 = arith.constant 25 : index
    %c0_135 = arith.constant 0 : index
    %104 = vector.load %arg15[%c25_134, %c0_135] : memref<40x64xf32, #tpu.memory_space<vmem>>, vector<2x64xf32>
    %c0_136 = arith.constant 0 : index
    %c1344 = arith.constant 1344 : index
    %105 = vector.load %arg16[%c0_136, %c1344] : memref<4x1600xf32, #tpu.memory_space<vmem>>, vector<2x64xf32>
    tpu.vector_store %arg16[%c0_136, %c1344], %104 {strides = array<i32>} : memref<4x1600xf32, #tpu.memory_space<vmem>>, vector<2x64xf32>,
    %c31 = arith.constant 31 : index
    %c0_137 = arith.constant 0 : index
    %106 = vector.load %arg15[%c31, %c0_137] : memref<40x64xf32, #tpu.memory_space<vmem>>, vector<2x64xf32>
    %c2_138 = arith.constant 2 : index
    %c1344_139 = arith.constant 1344 : index
    %107 = vector.load %arg16[%c2_138, %c1344_139] : memref<4x1600xf32, #tpu.memory_space<vmem>>, vector<2x64xf32>
    tpu.vector_store %arg16[%c2_138, %c1344_139], %106 {strides = array<i32>} : memref<4x1600xf32, #tpu.memory_space<vmem>>, vector<2x64xf32>,
    %c26_140 = arith.constant 26 : index
    %c0_141 = arith.constant 0 : index
    %108 = vector.load %arg15[%c26_140, %c0_141] : memref<40x64xf32, #tpu.memory_space<vmem>>, vector<2x64xf32>
    %c0_142 = arith.constant 0 : index
    %c1408 = arith.constant 1408 : index
    %109 = vector.load %arg16[%c0_142, %c1408] : memref<4x1600xf32, #tpu.memory_space<vmem>>, vector<2x64xf32>
    tpu.vector_store %arg16[%c0_142, %c1408], %108 {strides = array<i32>} : memref<4x1600xf32, #tpu.memory_space<vmem>>, vector<2x64xf32>,
    %c32 = arith.constant 32 : index
    %c0_143 = arith.constant 0 : index
    %110 = vector.load %arg15[%c32, %c0_143] : memref<40x64xf32, #tpu.memory_space<vmem>>, vector<2x64xf32>
    %c2_144 = arith.constant 2 : index
    %c1408_145 = arith.constant 1408 : index
    %111 = vector.load %arg16[%c2_144, %c1408_145] : memref<4x1600xf32, #tpu.memory_space<vmem>>, vector<2x64xf32>
    tpu.vector_store %arg16[%c2_144, %c1408_145], %110 {strides = array<i32>} : memref<4x1600xf32, #tpu.memory_space<vmem>>, vector<2x64xf32>,
    %c27_146 = arith.constant 27 : index
    %c0_147 = arith.constant 0 : index
    %112 = vector.load %arg15[%c27_146, %c0_147] : memref<40x64xf32, #tpu.memory_space<vmem>>, vector<2x64xf32>
    %c0_148 = arith.constant 0 : index
    %c1472 = arith.constant 1472 : index
    %113 = vector.load %arg16[%c0_148, %c1472] : memref<4x1600xf32, #tpu.memory_space<vmem>>, vector<2x64xf32>
    tpu.vector_store %arg16[%c0_148, %c1472], %112 {strides = array<i32>} : memref<4x1600xf32, #tpu.memory_space<vmem>>, vector<2x64xf32>,
    %c33 = arith.constant 33 : index
    %c0_149 = arith.constant 0 : index
    %114 = vector.load %arg15[%c33, %c0_149] : memref<40x64xf32, #tpu.memory_space<vmem>>, vector<2x64xf32>
    %c2_150 = arith.constant 2 : index
    %c1472_151 = arith.constant 1472 : index
    %115 = vector.load %arg16[%c2_150, %c1472_151] : memref<4x1600xf32, #tpu.memory_space<vmem>>, vector<2x64xf32>
    tpu.vector_store %arg16[%c2_150, %c1472_151], %114 {strides = array<i32>} : memref<4x1600xf32, #tpu.memory_space<vmem>>, vector<2x64xf32>,
    %c28_152 = arith.constant 28 : index
    %c0_153 = arith.constant 0 : index
    %116 = vector.load %arg15[%c28_152, %c0_153] : memref<40x64xf32, #tpu.memory_space<vmem>>, vector<2x64xf32>
    %c0_154 = arith.constant 0 : index
    %c1536 = arith.constant 1536 : index
    %117 = vector.load %arg16[%c0_154, %c1536] : memref<4x1600xf32, #tpu.memory_space<vmem>>, vector<2x64xf32>
    tpu.vector_store %arg16[%c0_154, %c1536], %116 {strides = array<i32>} : memref<4x1600xf32, #tpu.memory_space<vmem>>, vector<2x64xf32>,
    %c34 = arith.constant 34 : index
    %c0_155 = arith.constant 0 : index
    %118 = vector.load %arg15[%c34, %c0_155] : memref<40x64xf32, #tpu.memory_space<vmem>>, vector<2x64xf32>
    %c2_156 = arith.constant 2 : index
    %c1536_157 = arith.constant 1536 : index
    %119 = vector.load %arg16[%c2_156, %c1536_157] : memref<4x1600xf32, #tpu.memory_space<vmem>>, vector<2x64xf32>
    tpu.vector_store %arg16[%c2_156, %c1536_157], %118 {strides = array<i32>} : memref<4x1600xf32, #tpu.memory_space<vmem>>, vector<2x64xf32>,
    %c0_158 = arith.constant 0 : index
    %c0_159 = arith.constant 0 : index
    %120 = vector.load %arg16[%c0_158, %c0_159] : memref<4x1600xf32, #tpu.memory_space<vmem>>, vector<4x1600xf32>
    %c0_160 = arith.constant 0 : index
    %c0_161 = arith.constant 0 : index
    %121 = vector.load %arg5[%c0_160, %c0_161] : memref<1600x128xf32, #tpu.memory_space<vmem>>, vector<1600x128xf32>
    %cst_162 = arith.constant dense<0.000000e+00> : vector<4x128xf32>
    %122 = tpu.matmul %120, %121, %cst_162 {dimension_numbers = #tpu.dot_dimension_numbers<[1], [0], [0], [1], [0, 0, 1, 1], [], []>} : vector<4x1600xf32>, vector<1600x128xf32>, vector<4x128xf32> -> vector<4x128xf32>
    %c0_163 = arith.constant 0 : index
    %c0_164 = arith.constant 0 : index
    %123 = vector.load %arg6[%c0_163, %c0_164] : memref<1x128xf32, #tpu.memory_space<vmem>>, vector<1x128xf32>
    %124 = vector.broadcast %123 : vector<1x128xf32> to vector<4x128xf32>
    %125 = arith.mulf %122, %124 : vector<4x128xf32>
    %c0_165 = arith.constant 0 : index
    %c0_166 = arith.constant 0 : index
    %126 = vector.load %arg7[%c0_165, %c0_166] : memref<1x128xf32, #tpu.memory_space<vmem>>, vector<1x128xf32>
    %127 = vector.broadcast %126 : vector<1x128xf32> to vector<4x128xf32>
    %128 = arith.addf %125, %127 : vector<4x128xf32>
    %cst_167 = arith.constant 0.000000e+00 : f32
    %129 = vector.broadcast %cst_167 : f32 to vector<4x128xf32>
    %130 = arith.maximumf %128, %129 : vector<4x128xf32>
    %cst_168 = arith.constant dense<0xFF800000> : vector<128xf32>
    %131 = vector.multi_reduction <maximumf>, %130, %cst_168 [0] : vector<4x128xf32> to vector<128xf32>
    %132 = vector.shape_cast %131 : vector<128xf32> to vector<1x128xf32>
    %c0_169 = arith.constant 0 : index
    %c0_170 = arith.constant 0 : index
    %133 = vector.load %arg8[%c0_169, %c0_170] : memref<128x64xf32, #tpu.memory_space<vmem>>, vector<128x64xf32>
    %cst_171 = arith.constant dense<0.000000e+00> : vector<1x64xf32>
    %134 = tpu.matmul %132, %133, %cst_171 {dimension_numbers = #tpu.dot_dimension_numbers<[1], [0], [0], [1], [0, 0, 1, 1], [], []>} : vector<1x128xf32>, vector<128x64xf32>, vector<1x64xf32> -> vector<1x64xf32>
    %c0_172 = arith.constant 0 : index
    %c0_173 = arith.constant 0 : index
    %135 = vector.load %arg9[%c0_172, %c0_173] : memref<1x64xf32, #tpu.memory_space<vmem>>, vector<1x64xf32>
    %136 = arith.mulf %134, %135 : vector<1x64xf32>
    %c0_174 = arith.constant 0 : index
    %c0_175 = arith.constant 0 : index
    %137 = vector.load %arg10[%c0_174, %c0_175] : memref<1x64xf32, #tpu.memory_space<vmem>>, vector<1x64xf32>
    %138 = arith.addf %136, %137 : vector<1x64xf32>
    %cst_176 = arith.constant 0.000000e+00 : f32
    %139 = vector.broadcast %cst_176 : f32 to vector<1x64xf32>
    %140 = arith.maximumf %138, %139 : vector<1x64xf32>
    %141 = vector.extract_strided_slice %140 {offsets = [0, 0], sizes = [1, 32], strides = [1, 1]} : vector<1x64xf32> to vector<1x32xf32>
    %c0_177 = arith.constant 0 : index
    %c0_178 = arith.constant 0 : index
    %142 = vector.load %arg11[%c0_177, %c0_178] : memref<32x8xf32, #tpu.memory_space<vmem>>, vector<32x8xf32>
    %cst_179 = arith.constant dense<0.000000e+00> : vector<1x8xf32>
    %143 = tpu.matmul %141, %142, %cst_179 {dimension_numbers = #tpu.dot_dimension_numbers<[1], [0], [0], [1], [0, 0, 1, 1], [], []>} : vector<1x32xf32>, vector<32x8xf32>, vector<1x8xf32> -> vector<1x8xf32>
    %c0_180 = arith.constant 0 : index
    %c0_181 = arith.constant 0 : index
    %144 = vector.load %arg12[%c0_180, %c0_181] : memref<1x8xf32, #tpu.memory_space<vmem>>, vector<1x8xf32>
    %145 = arith.mulf %143, %144 : vector<1x8xf32>
    %c0_182 = arith.constant 0 : index
    %c0_183 = arith.constant 0 : index
    %146 = vector.load %arg13[%c0_182, %c0_183] : memref<1x8xf32, #tpu.memory_space<vmem>>, vector<1x8xf32>
    %147 = arith.addf %145, %146 : vector<1x8xf32>
    %148 = math.exp %147 : vector<1x8xf32>
    %c0_184 = arith.constant 0 : index
    %c0_185 = arith.constant 0 : index
    %c0_186 = arith.constant 0 : index
    %149 = vector.load %arg14[%c0_184, %c0_185, %c0_186] : memref<1x1x72xf32, #tpu.memory_space<vmem>>, vector<1x1x64xf32>
    %150 = vector.shape_cast %149 : vector<1x1x64xf32> to vector<1x64xf32>
    %151 = vector.shape_cast %140 : vector<1x64xf32> to vector<1x1x64xf32>
    tpu.vector_store %arg14[%c0_184, %c0_185, %c0_186], %151 {strides = array<i32>} : memref<1x1x72xf32, #tpu.memory_space<vmem>>, vector<1x1x64xf32>,
    %c0_187 = arith.constant 0 : index
    %c0_188 = arith.constant 0 : index
    %c64_189 = arith.constant 64 : index
    %152 = vector.load %arg14[%c0_187, %c0_188, %c64_189] : memref<1x1x72xf32, #tpu.memory_space<vmem>>, vector<1x1x8xf32>
    %153 = vector.shape_cast %152 : vector<1x1x8xf32> to vector<1x8xf32>
    %154 = vector.shape_cast %148 : vector<1x8xf32> to vector<1x1x8xf32>
    tpu.vector_store %arg14[%c0_187, %c0_188, %c64_189], %154 {strides = array<i32>} : memref<1x1x72xf32, #tpu.memory_space<vmem>>, vector<1x1x8xf32>,
    return
  }
  func.func @transform_0(%arg0: i32) -> (i32, i32, i32) {
    %c0_i32 = arith.constant 0 : i32
    %c0_i32_0 = arith.constant 0 : i32
    %c0_i32_1 = arith.constant 0 : i32
    return %arg0, %c0_i32, %c0_i32_0 : i32, i32, i32
  }
  func.func @transform_1(%arg0: i32) -> (i32, i32) {
    %c0_i32 = arith.constant 0 : i32
    %c0_i32_0 = arith.constant 0 : i32
    %c0_i32_1 = arith.constant 0 : i32
    return %c0_i32, %c0_i32_0 : i32, i32
  }
  func.func @transform_2(%arg0: i32) -> (i32, i32) {
    %c0_i32 = arith.constant 0 : i32
    %c0_i32_0 = arith.constant 0 : i32
    %c0_i32_1 = arith.constant 0 : i32
    return %c0_i32, %c0_i32_0 : i32, i32
  }
  func.func @transform_3(%arg0: i32) -> (i32, i32) {
    %c0_i32 = arith.constant 0 : i32
    %c0_i32_0 = arith.constant 0 : i32
    %c0_i32_1 = arith.constant 0 : i32
    return %c0_i32, %c0_i32_0 : i32, i32
  }
  func.func @transform_4(%arg0: i32) -> (i32, i32) {
    %c0_i32 = arith.constant 0 : i32
    %c0_i32_0 = arith.constant 0 : i32
    %c0_i32_1 = arith.constant 0 : i32
    return %c0_i32, %c0_i32_0 : i32, i32
  }
  func.func @transform_5(%arg0: i32) -> (i32, i32) {
    %c0_i32 = arith.constant 0 : i32
    %c0_i32_0 = arith.constant 0 : i32
    %c0_i32_1 = arith.constant 0 : i32
    return %c0_i32, %c0_i32_0 : i32, i32
  }
  func.func @transform_6(%arg0: i32) -> (i32, i32) {
    %c0_i32 = arith.constant 0 : i32
    %c0_i32_0 = arith.constant 0 : i32
    %c0_i32_1 = arith.constant 0 : i32
    return %c0_i32, %c0_i32_0 : i32, i32
  }
  func.func @transform_7(%arg0: i32) -> (i32, i32) {
    %c0_i32 = arith.constant 0 : i32
    %c0_i32_0 = arith.constant 0 : i32
    %c0_i32_1 = arith.constant 0 : i32
    return %c0_i32, %c0_i32_0 : i32, i32
  }
  func.func @transform_8(%arg0: i32) -> (i32, i32) {
    %c0_i32 = arith.constant 0 : i32
    %c0_i32_0 = arith.constant 0 : i32
    %c0_i32_1 = arith.constant 0 : i32
    return %c0_i32, %c0_i32_0 : i32, i32
  }
  func.func @transform_9(%arg0: i32) -> (i32, i32) {
    %c0_i32 = arith.constant 0 : i32
    %c0_i32_0 = arith.constant 0 : i32
    %c0_i32_1 = arith.constant 0 : i32
    return %c0_i32, %c0_i32_0 : i32, i32
  }
  func.func @transform_10(%arg0: i32) -> (i32, i32) {
    %c0_i32 = arith.constant 0 : i32
    %c0_i32_0 = arith.constant 0 : i32
    %c0_i32_1 = arith.constant 0 : i32
    return %c0_i32, %c0_i32_0 : i32, i32
  }
  func.func @transform_11(%arg0: i32) -> (i32, i32) {
    %c0_i32 = arith.constant 0 : i32
    %c0_i32_0 = arith.constant 0 : i32
    %c0_i32_1 = arith.constant 0 : i32
    return %c0_i32, %c0_i32_0 : i32, i32
  }
  func.func @transform_12(%arg0: i32) -> (i32, i32) {
    %c0_i32 = arith.constant 0 : i32
    %c0_i32_0 = arith.constant 0 : i32
    %c0_i32_1 = arith.constant 0 : i32
    return %c0_i32, %c0_i32_0 : i32, i32
  }
  func.func @transform_13(%arg0: i32) -> (i32, i32, i32) {
    %c0_i32 = arith.constant 0 : i32
    %c0_i32_0 = arith.constant 0 : i32
    %c0_i32_1 = arith.constant 0 : i32
    return %arg0, %c0_i32, %c0_i32_0 : i32, i32, i32
  }
}

</mosaic_0001>

<bundles_post_ra>
// kernel: tpu_custom_call.1
= control target key start
LH: loop header
LB: loop body
LE: loop exit
PB: predicated region body
PF: predicated region fallthrough
CT: control target
= control target key end

     0   :  { %s2309_s0 = inlined_call_operand.vmem [shape: f32[2,160,75], index: 0, kind: input, shape index: {}]   ;;  %s2310_s1 = inlined_call_operand.vmem [shape: f32[75,64], index: 1, kind: input, shape index: {}]   ;;  %s2311_s2 = inlined_call_operand.vmem [shape: f32[1,64], index: 2, kind: input, shape index: {}]   ;;  %s2312_s3 = inlined_call_operand.vmem [shape: f32[1,64], index: 3, kind: input, shape index: {}]   ;;  %s2313_s4 = inlined_call_operand.hbm [shape: f32[1600,128], index: 4, kind: input, shape index: {}]   ;;  %s2314_s5 = inlined_call_operand.vmem [shape: f32[1,128], index: 5, kind: input, shape index: {}]   ;;  %s2315_s6 = inlined_call_operand.vmem [shape: f32[1,128], index: 6, kind: input, shape index: {}]   ;;  %s2316_s7 = inlined_call_operand.vmem [shape: f32[128,64], index: 7, kind: input, shape index: {}]   ;;  %s2317_s8 = inlined_call_operand.vmem [shape: f32[1,64], index: 8, kind: input, shape index: {}]   ;;  %s2318_s9 = inlined_call_operand.vmem [shape: f32[1,64], index: 9, kind: input, shape index: {}]   ;;  %s2319_s10 = inlined_call_operand.vmem [shape: f32[32,8], index: 10, kind: input, shape index: {}]   ;;  %s2320_s11 = inlined_call_operand.vmem [shape: f32[1,8], index: 11, kind: input, shape index: {}]   ;;  %s2321_s12 = inlined_call_operand.vmem [shape: f32[1,8], index: 12, kind: input, shape index: {}]   ;;  %s2322_s13 = inlined_call_operand.hbm [shape: f32[2,1,72], index: 13, kind: output, shape index: {}]  }
   0x1   :  { %2326 = sst [smem:[#allocation13_spill]] %s2313_s4 }
   0x2   :  { %18 = vsyncpa [#allocation5], 0 }
   0x3   :  { %19 = vsyncpa [#allocation6], 0 }
   0x4   :  { %21 = vsyncpa [#allocation6 + $0x1], 0  ;;  %s1924_s25 = smov 0   ;;  %s1926_s26 = smov 0  }
   0x5   :  { %s1928_s27 = smov 0   ;;  %s1930_s28 = smov 0  }
   0x6 LB: > { %2327 = sst [smem:[#allocation10_spill]] %s1844_s27  ;;  %s1945_s29 = sadd.s32 4294967295, %s1848_s28   ;;  %s1848_s28 = sphi %s1930_s28, %s2333_s28   ;;  %s1844_s27 = sphi %s1928_s27, %s2335_s27   ;;  %s1840_s26 = sphi %s1926_s26, %s2337_s26   ;;  %s1836_s25 = sphi %s1924_s25, %s2336_s25  }
   0x7   : > { %s1660_s30 = sadd.s32 4294967294, %s1848_s28   ;;  %s1949_s14 = sadd.s32 1, %s1848_s28  }
   0x8   : > { %2328 = sst [smem:[#allocation11_spill]] %s1949_s14  ;;  %s312_s15 = sadd.s32 1, %s1844_s27 }
   0x9   : > { %s309_s16 = ssub.s32 %s1848_s28, %s1949_s14  ;;  %p322_p0 = scmp.ne.s32.totalorder %s1844_s27, %s1840_s26 }
   0xa   : > { %p310_p1 = scmp.eq.s32.totalorder %s309_s16, 0  ;;  %p323_p2 = scmp.eq.s32.totalorder %s1945_s29, 1 }
   0xb   : > { %p328_p3 = scmp.ne.s32.totalorder %s1840_s26, %s1836_s25  ;;  %p329_p4 = scmp.eq.s32.totalorder %s1660_s30, 1 }
   0xc   : > { %s1960_s17 = scalar_select %p310_p1, %s1844_s27, %s312_s15  }
   0xd   : > { %p1962_p5 = por %p323_p2, %p322_p0  ;;  %p1966_p6 = por %p329_p4, %p328_p3 }
   0xe   : > { %2329 = sst [smem:[#allocation12_spill]] %s1960_s17  ;;  %p1661_p7 = scmp.ge.s32.totalorder %s1848_s28, 1 }
   0xf   : > { %p336_p8 = scmp.lt.s32.totalorder %s1848_s28, 3  ;;  %p1707_p9 = scmp.eq.s32.totalorder %s1945_s29, 0 }
  0x10   : > { %s2332_s4 = sld [smem:[#allocation13_spill]]  ;;  %s1850_s23 = smov [#allocation4]  }
  0x11   : > { %p337_p10 = pnand %p1661_p7, %p336_p8  ;;  %s358_s24 = sshll.u32 %s1850_s23, 4  ;;  %s359_s24 = int_to_ptr.vmem [resolvable:$true] %s358_s24 }
  0x12   : > { %s1851_s30 = smov 128   ;;  %s1852_s15 = smov 8  }
  0x13   : > { %p1699_p11 = pneg %p337_p10  ;;  %406 = sbr.rel (%p337_p10) target bundleno = 1088 (0x440), region = 72 }
  0x15   : > { %p1700_p12 = pnand %p1707_p9, %p1699_p11 }
  0x16   : > { %s356_s22 = sshll.u32 %s2332_s4, 4  ;;  %s357_s22 = int_to_ptr.hbm [resolvable:$true] %s356_s22 }
  0x17   : > { %1702 = dma.hbm_to_vmem [thread:$0]  (!%p1700_p12), %s357_s22, 25600, %s359_s24, [#allocation5], %s1851_s30, %s1851_s30, %s1852_s15  }
  0x18   : > { %1827 = dma.done.wait (%p1707_p9), [#allocation5], 25600  }
  0x19   : > { %1829 = vsyncadd (%p1707_p9), [#allocation5], 4294941696  ;;  %vm546_vm0 = vcmask 1042432   ;;  %v484_v0 = vld [vmem:[%s2310_s1 + $0x48] sm:$0x7]  ;;  %v483_v1 = vld [vmem:[%s2310_s1 + $0x40] sm:$0xff]  ;;  %s1589_s15 = scalar_lea.hbm %s2322_s13, %s1945_s29 }
  0x1a   : > { %1667 = vmatpush.msk.msra.mxu0 %vm546_vm0, %v484_v0  ;;  %v482_v2 = vld [vmem:[%s2310_s1 + $0x38] sm:$0xff]  ;;  %p450_p13 = scmp.lt.s32.totalorder %s1945_s29, 1  ;;  %v481_v3 = vld [vmem:[%s2310_s1 + $0x30] sm:$0xff]  ;;  %v480_v4 = vld [vmem:[%s2310_s1 + $0x28] sm:$0xff]  ;;  %vm485_vm1 = vcmask 613376   ;;  %vm710_vm2 = vcmask 523264  }
  0x1b   : > { %v479_v5 = vld [vmem:[%s2310_s1 + $0x20] sm:$0xff]  ;;  %v478_v6 = vld [vmem:[%s2310_s1 + $0x18] sm:$0xff]  ;;  %v477_v7 = vld [vmem:[%s2310_s1 + $0x10] sm:$0xff]  ;;  %vm717_vm3 = vcmask 517120   ;;  %vm723_vm4 = vcmask 519170   ;;  %vm730_vm5 = vcmask 1041920  }
  0x1c   : > { %557 = vmatpush.msra.mxu0 %v483_v1  ;;  %s451_s16 = scalar_select %p450_p13, %s1945_s29, 1  ;;  %v476_v8 = vld [vmem:[%s2310_s1 + $0x8] sm:$0xff]  ;;  %v475_v9 = vld [vmem:[%s2310_s1] sm:$0xff]  ;;  %vm738_vm6 = vcmask 1043970   ;;  %vm1489_vm7 = vcmask 1043456   ;;  %vm1542_vm8 = vcmask 261120  }
  0x1d   : > { %v2062_v35 = vld [vmem:[%s2311_s2] ss:$0 sm:$0xff]  ;;  %vm1572_vm9 = vcmask 516096   ;;  %s1593_s17 = sshll.u32 %s1589_s15, 4  ;;  %vm1578_vm10 = vcmask 582144   ;;  %s1802_s22 = scalar_lea.hbm %s2322_s13, 2  ;;  %s1594_s17 = int_to_ptr.hbm [resolvable:$true] %s1593_s17 }
  0x1e   : > { %558 = vmatpush.msra.mxu0 %v482_v2  ;;  %s1692_s24 = smul.u32 160, %s451_s16  ;;  %v2068_v37 = vld [vmem:[%s2312_s3] ss:$0 sm:$0xff]  ;;  %s1796_s27 = sshra.s32 %s1594_s17, 4  ;;  %s1797_s27 = int_to_ptr.hbm [resolvable:$true] %s1796_s27 }
  0x1f   : > { %s1798_s14 = scalar_lea.hbm %s1797_s27, 1  ;;  %p1803_p3 = scmp.lt.s32.totalorder %s1797_s27, %s2322_s13 }
  0x20   : > { %559 = vmatpush.msra.mxu0 %v481_v3  ;;  %s2014_s20 = scalar_lea.vmem %s2309_s0, %s1692_s24  ;;  %s1853_s24 = smov 64  }
  0x21   : > { %v455_v10 = vld [vmem:[%s2014_s20] sm:$0xff]  ;;  %v456_v11 = vld [vmem:[%s2014_s20 + $0x8] sm:$0xff]  ;;  %v457_v12 = vld [vmem:[%s2014_s20 + $0x10] sm:$0xff]  ;;  %p1799_p0 = scmp.ne.s32.totalorder %s1797_s27, %s1798_s14  ;;  %p1804_p4 = scmp.lt.s32.totalorder %s1802_s22, %s1798_s14 }
  0x22   : > { %560 = vmatpush.msra.mxu0 %v480_v4  ;;  %v458_v13 = vld [vmem:[%s2014_s20 + $0x18] sm:$0xff]  ;;  %v459_v14 = vld [vmem:[%s2014_s20 + $0x20] sm:$0xff]  ;;  %v460_v15 = vld [vmem:[%s2014_s20 + $0x28] sm:$0xff] }
  0x23   : > { %v461_v16 = vld [vmem:[%s2014_s20 + $0x30] sm:$0xff]  ;;  %v462_v17 = vld [vmem:[%s2014_s20 + $0x38] sm:$0xff]  ;;  %v463_v18 = vld [vmem:[%s2014_s20 + $0x40] sm:$0xff]  ;;  %p1800_p1 = pnand %p1799_p0, %p1962_p5  ;;  %p1805_p7 = por %p1804_p4, %p1803_p3 }
  0x24   : > { %561 = vmatpush.msra.mxu0 %v479_v5  ;;  %v464_v19 = vld [vmem:[%s2014_s20 + $0x48] sm:$0xff]  ;;  %v465_v20 = vld [vmem:[%s2014_s20 + $0x50] sm:$0xff]  ;;  %v466_v21 = vld [vmem:[%s2014_s20 + $0x58] sm:$0xff] }
  0x25   : > { %v467_v22 = vld [vmem:[%s2014_s20 + $0x60] sm:$0xff]  ;;  %v468_v23 = vld [vmem:[%s2014_s20 + $0x68] sm:$0xff]  ;;  %v469_v24 = vld [vmem:[%s2014_s20 + $0x70] sm:$0xff]  ;;  %p1801_p2 = pneg %p1800_p1 }
  0x26   : > { %562 = vmatpush.msra.mxu0 %v478_v6  ;;  %v470_v25 = vld [vmem:[%s2014_s20 + $0x78] sm:$0xff]  ;;  %v471_v27 = vld [vmem:[%s2014_s20 + $0x80] sm:$0xff]  ;;  %v472_v29 = vld [vmem:[%s2014_s20 + $0x88] sm:$0xff] }
  0x27   : > { %v473_v31 = vld [vmem:[%s2014_s20 + $0x90] sm:$0xff]  ;;  %v474_v33 = vld [vmem:[%s2014_s20 + $0x98] sm:$0xff]  ;;  %s448_s20 = sand.u32 1, %s1840_s26   ;;  %p1806_p8 = pnand %p1805_p7, %p1801_p2 }
  0x28   : > { %563 = vmatpush.msra.mxu0 %v477_v7  ;;  %s449_s16 = scalar_lea.vmem [#allocation7], %s448_s20  ;;  %s1581_s21 = scalar_lea.sflag [#allocation6], %s448_s20 }
  0x29   : > { %s1591_s4 = sshll.u32 %s449_s16, 4  ;;  %s1592_s4 = int_to_ptr.vmem [resolvable:$true] %s1591_s4 }
  0x2a   : > { %564 = vmatpush.msra.mxu0 %v476_v8 }
  0x2c   : > { %565 = vmatpush.msra.mxu0 %v475_v9 }
  0x2d   : > { %1668 = vmatmul.msk.f32.vlgmr.msra.gmra.mxu0 %vm485_vm1, %v455_v10 }
  0x35   : > { %1669 = vmatmul.msk.f32.gmra.mxu0 %vm485_vm1, %v456_v11 }
  0x3d   : > { %1670 = vmatmul.msk.f32.gmra.mxu0 %vm485_vm1, %v457_v12 }
  0x45   : > { %1671 = vmatmul.msk.f32.gmra.mxu0 %vm485_vm1, %v458_v13 }
  0x4d   : > { %1672 = vmatmul.msk.f32.gmra.mxu0 %vm485_vm1, %v459_v14 }
  0x55   : > { %1673 = vmatmul.msk.f32.gmra.mxu0 %vm485_vm1, %v460_v15 }
  0x5d   : > { %1674 = vmatmul.msk.f32.gmra.mxu0 %vm485_vm1, %v461_v16 }
  0x65   : > { %1675 = vmatmul.msk.f32.gmra.mxu0 %vm485_vm1, %v462_v17 }
  0x6d   : > { %1676 = vmatmul.msk.f32.gmra.mxu0 %vm485_vm1, %v463_v18 }
  0x75   : > { %1677 = vmatmul.msk.f32.gmra.mxu0 %vm485_vm1, %v464_v19 }
  0x7d   : > { %1678 = vmatmul.msk.f32.gmra.mxu0 %vm485_vm1, %v465_v20 }
  0x85   : > { %1679 = vmatmul.msk.f32.gmra.mxu0 %vm485_vm1, %v466_v21 }
  0x8d   : > { %1680 = vmatmul.msk.f32.gmra.mxu0 %vm485_vm1, %v467_v22 }
  0x95   : > { %1681 = vmatmul.msk.f32.gmra.mxu0 %vm485_vm1, %v468_v23 }
  0x9d   : > { %1682 = vmatmul.msk.f32.gmra.mxu0 %vm485_vm1, %v469_v24 }
  0xa5   : > { %1683 = vmatmul.msk.f32.gmra.mxu0 %vm485_vm1, %v470_v25 }
  0xaa   : > { %v567_v26 = vpop.f32.mrf.mxu0 }
  0xab   : > { %v631_v36 = vmul.f32 %v2062_v35, %v567_v26 }
  0xad   : > { %1684 = vmatmul.msk.f32.gmra.mxu0 %vm485_vm1, %v471_v27  ;;  %v655_v39 = vadd.f32 %v2068_v37, %v631_v36 }
  0xaf   : > { %v675_v42 = vmax.f32 %v655_v39, 0.0 }
  0xb2   : > { %v570_v28 = vpop.f32.mrf.mxu0 }
  0xb3   : > { %v632_v43 = vmul.f32 %v2062_v35, %v570_v28 }
  0xb5   : > { %1685 = vmatmul.msk.f32.gmra.mxu0 %vm485_vm1, %v472_v29  ;;  %v656_v47 = vadd.f32 %v2068_v37, %v632_v43 }
  0xb7   : > { %v676_v50 = vmax.f32 %v656_v47, 0.0 }
  0xba   : > { %v573_v30 = vpop.f32.mrf.mxu0 }
  0xbb   : > { %v633_v51 = vmul.f32 %v2062_v35, %v573_v30 }
  0xbd   : > { %1686 = vmatmul.msk.f32.gmra.mxu0 %vm485_vm1, %v473_v31  ;;  %v657_v55 = vadd.f32 %v2068_v37, %v633_v51 }
  0xbf   : > { %v677_v58 = vmax.f32 %v657_v55, 0.0 }
  0xc2   : > { %v576_v32 = vpop.f32.mrf.mxu0 }
  0xc3   : > { %v634_v59 = vmul.f32 %v2062_v35, %v576_v32 }
  0xc5   : > { %1687 = vmatmul.msk.f32.gmra.mxu0 %vm485_vm1, %v474_v33  ;;  %v658_v63 = vadd.f32 %v2068_v37, %v634_v59 }
  0xc7   : > { %v678_v2 = vmax.f32 %v658_v63, 0.0 }
  0xca   : > { %v579_v34 = vpop.f32.mrf.mxu0 }
  0xcb   : > { %v635_v3 = vmul.f32 %v2062_v35, %v579_v34 }
  0xcd   : > { %v659_v7 = vadd.f32 %v2068_v37, %v635_v3 }
  0xcf   : > { %v679_v10 = vmax.f32 %v659_v7, 0.0 }
  0xd2   : > { %v582_v38 = vpop.f32.mrf.mxu0 }
  0xd3   : > { %v636_v40 = vmul.f32 %v2062_v35, %v582_v38 }
  0xd5   : > { %v660_v41 = vadd.f32 %v2068_v37, %v636_v40 }
  0xd7   : > { %v680_v44 = vmax.f32 %v660_v41, 0.0 }
  0xd9   : > { %v695_v45 = vmax.f32 %v675_v42, %v680_v44 }
  0xda   : > { %v585_v46 = vpop.f32.mrf.mxu0 }
  0xdb   : > { %v637_v48 = vmul.f32 %v2062_v35, %v585_v46 }
  0xdd   : > { %v661_v49 = vadd.f32 %v2068_v37, %v637_v48 }
  0xdf   : > { %v681_v52 = vmax.f32 %v661_v49, 0.0 }
  0xe1   : > { %v696_v53 = vmax.f32 %v676_v50, %v681_v52 }
  0xe2   : > { %v588_v54 = vpop.f32.mrf.mxu0 }
  0xe3   : > { %v638_v56 = vmul.f32 %v2062_v35, %v588_v54 }
  0xe5   : > { %v662_v57 = vadd.f32 %v2068_v37, %v638_v56 }
  0xe7   : > { %v682_v60 = vmax.f32 %v662_v57, 0.0 }
  0xe9   : > { %v2082_v61 = vmax.f32 %v677_v58, %v682_v60 }
  0xea   : > { %v591_v62 = vpop.f32.mrf.mxu0 }
  0xeb   : > { %v639_v0 = vmul.f32 %v2062_v35, %v591_v62 }
  0xed   : > { %v663_v1 = vadd.f32 %v2068_v37, %v639_v0 }
  0xef   : > { %v683_v4 = vmax.f32 %v663_v1, 0.0 }
  0xf1   : > { %v2088_v5 = vmax.f32 %v678_v2, %v683_v4 }
  0xf2   : > { %v594_v6 = vpop.f32.mrf.mxu0 }
  0xf3   : > { %v640_v8 = vmul.f32 %v2062_v35, %v594_v6 }
  0xf5   : > { %v664_v9 = vadd.f32 %v2068_v37, %v640_v8 }
  0xf7   : > { %v684_v11 = vmax.f32 %v664_v9, 0.0 }
  0xf9   : > { %v2093_v12 = vmax.f32 %v679_v10, %v684_v11 }
  0xfa   : > { %v597_v13 = vpop.f32.mrf.mxu0 }
  0xfb   : > { %v641_v18 = vmul.f32 %v2062_v35, %v597_v13 }
  0xfd   : > { %v665_v20 = vadd.f32 %v2068_v37, %v641_v18 }
  0xff   : > { %v685_v23 = vmax.f32 %v665_v20, 0.0 }
 0x102   : > { %v600_v14 = vpop.f32.mrf.mxu0 }
 0x103   : > { %v642_v24 = vmul.f32 %v2062_v35, %v600_v14 }
 0x105   : > { %v666_v28 = vadd.f32 %v2068_v37, %v642_v24 }
 0x107   : > { %v686_v32 = vmax.f32 %v666_v28, 0.0 }
 0x10a   : > { %v603_v15 = vpop.f32.mrf.mxu0 }
 0x10b   : > { %v643_v33 = vmul.f32 %v2062_v35, %v603_v15 }
 0x10d   : > { %v667_v39 = vadd.f32 %v2068_v37, %v643_v33 }
 0x10f   : > { %v687_v50 = vmax.f32 %v667_v39, 0.0 }
 0x112   : > { %v606_v16 = vpop.f32.mrf.mxu0 }
 0x113   : > { %v644_v51 = vmul.f32 %v2062_v35, %v606_v16 }
 0x115   : > { %v668_v56 = vadd.f32 %v2068_v37, %v644_v51 }
 0x117   : > { %v688_v3 = vmax.f32 %v668_v56, 0.0 }
 0x11a   : > { %v609_v17 = vpop.f32.mrf.mxu0 }
 0x11b   : > { %v645_v1 = vmul.f32 %v2062_v35, %v609_v17 }
 0x11d   : > { %v669_v13 = vadd.f32 %v2068_v37, %v645_v1 }
 0x122   : > { %v612_v19 = vpop.f32.mrf.mxu0 }
 0x123   : > { %v646_v21 = vmul.f32 %v2062_v35, %v612_v19 }
 0x125   : > { %v670_v22 = vadd.f32 %v2068_v37, %v646_v21 }
 0x127   : > { %v690_v25 = vmax.f32 %v670_v22, 0.0 }
 0x129   : > { %v700_v26 = vmax.f32 %v685_v23, %v690_v25  ;;  %v689_v25 = vmax.f32 %v669_v13, 0.0 }
 0x12a   : > { %v615_v27 = vpop.f32.mrf.mxu0 }
 0x12b   : > { %v705_v29 = vmax.f32 %v695_v45, %v700_v26  ;;  %v647_v30 = vmul.f32 %v2062_v35, %v615_v27 }
 0x12d   : > { %711 = vst.msk [vmem:[#allocation2] sm:$0xff] %vm710_vm2, %v705_v29  ;;  %v671_v31 = vadd.f32 %v2068_v37, %v647_v30 }
 0x12f   : > { %v691_v34 = vmax.f32 %v671_v31, 0.0 }
 0x131   : > { %v701_v36 = vmax.f32 %v686_v32, %v691_v34 }
 0x132   : > { %v618_v38 = vpop.f32.mrf.mxu0 }
 0x133   : > { %v706_v40 = vmax.f32 %v696_v53, %v701_v36  ;;  %v648_v41 = vmul.f32 %v2062_v35, %v618_v38 }
 0x134   : > { %v767_v42 = vld [vmem:[#allocation2 + $0x6] sm:$0x3]  ;;  %v747_v43 = vld [vmem:[#allocation2 + $0x3] sm:$0x3]  ;;  %v725_v44 = vld [vmem:[#allocation2 + $0x1] sm:$0x3] }
 0x135   : > { %712 = vst.msk [vmem:[#allocation2 + $0x8] sm:$0xff] %vm710_vm2, %v706_v40  ;;  %v672_v45 = vadd.f32 %v2068_v37, %v648_v41  ;;  %769 = vrot.lane.b32.xlu2 %v767_v42, %s1853_s24  ;;  %749 = vrot.lane.b32.xlu1 %v747_v43, %s1853_s24  ;;  %v760_v46 = vld [vmem:[#allocation2 + $0x4] sm:$0x3]  ;;  %v740_v47 = vld [vmem:[#allocation2 + $0x2] sm:$0x3]  ;;  %v1005_v43 = vld [vmem:[#allocation4 + $0xf8] sm:$0xff] }
 0x136   : > { %727 = vrot.lane.b32.xlu0 %v725_v44, %s1853_s24  ;;  %761 = vst.msk [vmem:[#allocation3 + $0x8] sm:$0x3] %vm717_vm3, %v760_v46  ;;  %v716_v48 = vld [vmem:[#allocation2] sm:$0x3]  ;;  %v719_v49 = vld [vmem:[#allocation2 + $0x6] sm:$0x3]  ;;  %1238 = vmatpush.msra.mxu2 %v1005_v43 }
 0x137   : > { %v692_v52 = vmax.f32 %v672_v45, 0.0  ;;  %741 = vst.msk [vmem:[#allocation3 + $0x4] sm:$0x3] %vm717_vm3, %v740_v47  ;;  %v721_v53 = vrot.slane %v719_v49, 6  ;;  %v988_v44 = vld [vmem:[#allocation4 + $0x70] sm:$0xff]  ;;  %v1021_v47 = vld [vmem:[#allocation4 + $0x178] sm:$0xff] }
 0x138   : > { %718 = vst.msk [vmem:[#allocation3] sm:$0x3] %vm717_vm3, %v716_v48  ;;  %v1004_v46 = vld [vmem:[#allocation4 + $0xf0] sm:$0xff]  ;;  %v987_v48 = vld [vmem:[#allocation4 + $0x68] sm:$0xff]  ;;  %1258 = vmatpush.msra.mxu3 %v1021_v47  ;;  %v977_v47 = vld [vmem:[#allocation4 + $0x18] sm:$0xff] }
 0x139   : > { %v702_v54 = vmax.f32 %v687_v50, %v692_v52  ;;  %724 = vst.msk [vmem:[#allocation3] sm:$0xc] %vm723_vm4, %v721_v53  ;;  %v1003_v49 = vld [vmem:[#allocation4 + $0xe8] sm:$0xff]  ;;  %v1020_v50 = vld [vmem:[#allocation4 + $0x170] sm:$0xff]  ;;  %1239 = vmatpush.msra.mxu2 %v1004_v46 }
 0x13a   : > { %v621_v55 = vpop.f32.mrf.mxu0  ;;  %1259 = vmatpush.msra.mxu3 %v1020_v50  ;;  %v1012_v43 = vld [vmem:[#allocation4 + $0x130] sm:$0xff]  ;;  %v1011_v46 = vld [vmem:[#allocation4 + $0x128] sm:$0xff] }
 0x13b   : > { %v707_v57 = vmax.f32 %v2082_v61, %v702_v54  ;;  %v649_v58 = vmul.f32 %v2062_v35, %v621_v55  ;;  %1240 = vmatpush.msra.mxu2 %v1003_v49  ;;  %v1010_v49 = vld [vmem:[#allocation4 + $0x120] sm:$0xff]  ;;  %v976_v50 = vld [vmem:[#allocation4 + $0x10] sm:$0xff] }
 0x13c   : > { %v807_v59 = vld [vmem:[#allocation2 + $0xa] sm:$0x3]  ;;  %v787_v60 = vld [vmem:[#allocation2 + $0x8] sm:$0x3]  ;;  %v773_v2 = vld [vmem:[#allocation2 + $0xc] sm:$0x3] }
 0x13d   : > { %v753_v62 = vld [vmem:[#allocation2 + $0x9] sm:$0x3]  ;;  %713 = vst.msk [vmem:[#allocation2 + $0x10] sm:$0xff] %vm710_vm2, %v707_v57  ;;  %v673_v63 = vadd.f32 %v2068_v37, %v649_v58  ;;  %809 = vrot.lane.b32.xlu2 %v807_v59, %s1853_s24  ;;  %v780_v8 = vld [vmem:[#allocation2 + $0x7] sm:$0x3]  ;;  %v775_v19 = vrot.slane %v773_v2, 6 }
 0x13e   : > { %v755_v0 = vrot.slane %v753_v62, 6  ;;  %789 = vrot.lane.b32.xlu0 %v787_v60, %s1853_s24  ;;  %v800_v61 = vld [vmem:[#allocation2 + $0x9] sm:$0x3]  ;;  %v732_v10 = vld [vmem:[#allocation2 + $0x7] sm:$0x3] }
 0x13f   : > { %v693_v4 = vmax.f32 %v673_v63, 0.0  ;;  %v762_v6 = vld [vmem:[#allocation2 + $0xa] sm:$0x3]  ;;  %801 = vst.msk [vmem:[#allocation3 + $0x10] sm:$0x3] %vm717_vm3, %v800_v61  ;;  %v734_v20 = vrot.slane %v732_v10, 6 }
 0x140   : > { %756 = vrot.lane.b32.xlu1 %v755_v0, %s1853_s24  ;;  %v764_v7 = vrot.slane %v762_v6, 6  ;;  %v793_v11 = vld [vmem:[#allocation2 + $0xe] sm:$0x3]  ;;  %781 = vst.msk [vmem:[#allocation3 + $0xc] sm:$0x3] %vm717_vm3, %v780_v8 }
 0x141   : > { %v703_v9 = vmax.f32 %v688_v3, %v693_v4  ;;  %v742_v15 = vld [vmem:[#allocation2 + $0x8] sm:$0x3]  ;;  %v820_v16 = vld [vmem:[#allocation2 + $0xc] sm:$0x3]  ;;  %v795_v23 = vrot.slane %v793_v11, 6 }
 0x142   : > { %v624_v14 = vpop.f32.mrf.mxu0  ;;  %766 = vst.msk [vmem:[#allocation3 + $0x8] sm:$0xc] %vm723_vm4, %v764_v7  ;;  %v782_v21 = vld [vmem:[#allocation2 + $0xd] sm:$0x3]  ;;  %v744_v24 = vrot.slane %v742_v15, 6 }
 0x143   : > { %v708_v17 = vmax.f32 %v2088_v5, %v703_v9  ;;  %v650_v18 = vmul.f32 %v2062_v35, %v624_v14  ;;  %821 = vst.msk [vmem:[#allocation3 + $0x14] sm:$0x3] %vm717_vm3, %v820_v16  ;;  %v784_v27 = vrot.slane %v782_v21, 6  ;;  %v827_v39 = vld [vmem:[#allocation2 + $0xd] sm:$0x3] }
 0x144   : > { %v822_v35 = vld [vmem:[#allocation2 + $0x12] sm:$0x3]  ;;  %v860_v5 = vld [vmem:[#allocation2 + $0x10] sm:$0x3]  ;;  %746 = vst.msk [vmem:[#allocation3 + $0x4] sm:$0xc] %vm723_vm4, %v744_v24 }
 0x145   : > { %714 = vst.msk [vmem:[#allocation2 + $0x18] sm:$0xff] %vm710_vm2, %v708_v17  ;;  %v674_v22 = vadd.f32 %v2068_v37, %v650_v18  ;;  %776 = vrot.lane.b32.xlu2 %v775_v19, %s1853_s24  ;;  %v833_v28 = vld [vmem:[#allocation2 + $0x13] sm:$0x3]  ;;  %v824_v29 = vrot.slane %v822_v35, 6  ;;  %v813_v31 = vld [vmem:[#allocation2 + $0x10] sm:$0x3] }
 0x146   : > { %735 = vrot.lane.b32.xlu0 %v734_v20, %s1853_s24  ;;  %861 = vst.msk [vmem:[#allocation3 + $0x1c] sm:$0x3] %vm717_vm3, %v860_v5  ;;  %v802_v37 = vld [vmem:[#allocation2 + $0xf] sm:$0x3]  ;;  %v835_v33 = vrot.slane %v833_v28, 6  ;;  %v815_v36 = vrot.slane %v813_v31, 6 }
 0x147   : > { %v694_v26 = vmax.f32 %v674_v22, 0.0  ;;  %826 = vst.msk [vmem:[#allocation3 + $0x14] sm:$0xc] %vm723_vm4, %v824_v29  ;;  %v804_v38 = vrot.slane %v802_v37, 6  ;;  %v840_v40 = vld [vmem:[#allocation2 + $0xe] sm:$0x3] }
 0x148   : > { %796 = vrot.lane.b32.xlu1 %v795_v23, %s1853_s24  ;;  %786 = vst.msk [vmem:[#allocation3 + $0xc] sm:$0xc] %vm723_vm4, %v784_v27  ;;  %v880_v41 = vld [vmem:[#allocation2 + $0x13] sm:$0x3]  ;;  %v900_v45 = vld [vmem:[#allocation2 + $0x15] sm:$0x3] }
 0x149   : > { %v704_v30 = vmax.f32 %v689_v25, %v694_v26  ;;  %v842_v42 = vld [vmem:[#allocation2 + $0x14] sm:$0x3]  ;;  %806 = vst.msk [vmem:[#allocation3 + $0x10] sm:$0xc] %vm723_vm4, %v804_v38  ;;  %v862_v53 = vld [vmem:[#allocation2 + $0x16] sm:$0x3] }
 0x14a   : > { %841 = vst.msk [vmem:[#allocation3 + $0x18] sm:$0x3] %vm717_vm3, %v840_v40  ;;  %v867_v54 = vld [vmem:[#allocation2 + $0x12] sm:$0x3]  ;;  %v844_v56 = vrot.slane %v842_v42, 6  ;;  %v864_v60 = vrot.slane %v862_v53, 6 }
 0x14b   : > { %v709_v32 = vmax.f32 %v2093_v12, %v704_v30  ;;  %v989_v12 = vld [vmem:[#allocation4 + $0x78] sm:$0xff]  ;;  %881 = vst.msk [vmem:[#allocation3 + $0x20] sm:$0x3] %vm717_vm3, %v880_v41  ;;  %v847_v57 = vld [vmem:[#allocation2 + $0xf] sm:$0x3]  ;;  %v986_v22 = vld [vmem:[#allocation4 + $0x60] sm:$0xff] }
 0x14c   : > { %v960_v34 = vld [vmem:[#allocation2 + $0x1c] sm:$0x3]  ;;  %1218 = vmatpush.msra.mxu1 %v989_v12  ;;  %v920_v51 = vld [vmem:[#allocation2 + $0x18] sm:$0x3]  ;;  %901 = vst.msk [vmem:[#allocation3 + $0x24] sm:$0x3] %vm717_vm3, %v900_v45 }
 0x14d   : > { %961 = vst.msk [vmem:[#allocation3 + $0x30] sm:$0x3] %vm717_vm3, %v960_v34  ;;  %836 = vrot.lane.b32.xlu2 %v835_v33, %s1853_s24  ;;  %v882_v52 = vld [vmem:[#allocation2 + $0x19] sm:$0x3]  ;;  %v902_v58 = vld [vmem:[#allocation2 + $0x1b] sm:$0x3] }
 0x14e   : > { %715 = vst.msk [vmem:[#allocation2 + $0x20] sm:$0xff] %vm710_vm2, %v709_v32  ;;  %816 = vrot.lane.b32.xlu0 %v815_v36, %s1853_s24  ;;  %1219 = vmatpush.msra.mxu1 %v988_v44  ;;  %v884_v55 = vrot.slane %v882_v52, 6  ;;  %v922_v62 = vld [vmem:[#allocation2 + $0x1e] sm:$0x3]  ;;  %v887_v0 = vld [vmem:[#allocation2 + $0x14] sm:$0x3] }
 0x14f   : > { %921 = vst.msk [vmem:[#allocation3 + $0x28] sm:$0x3] %vm717_vm3, %v920_v51  ;;  %v904_v2 = vrot.slane %v902_v58, 6  ;;  %v924_v4 = vrot.slane %v922_v62, 6  ;;  %v853_v61 = vld [vmem:[#allocation2 + $0x15] sm:$0x3] }
 0x150   : > { %829 = vrot.lane.b32.xlu1 %v827_v39, %s1853_s24  ;;  %1220 = vmatpush.msra.mxu1 %v987_v48  ;;  %886 = vst.msk [vmem:[#allocation3 + $0x20] sm:$0xc] %vm723_vm4, %v884_v55  ;;  %v940_v6 = vld [vmem:[#allocation2 + $0x1a] sm:$0x3]  ;;  %v907_v8 = vld [vmem:[#allocation2 + $0x16] sm:$0x3] }
 0x151   : > { %846 = vst.msk [vmem:[#allocation3 + $0x18] sm:$0xc] %vm723_vm4, %v844_v56  ;;  %v927_v7 = vld [vmem:[#allocation2 + $0x19] sm:$0x3]  ;;  %v855_v9 = vrot.slane %v853_v61, 6  ;;  %v1002_v23 = vld [vmem:[#allocation4 + $0xe0] sm:$0xff] }
 0x152   : > { %866 = vst.msk [vmem:[#allocation3 + $0x1c] sm:$0xc] %vm723_vm4, %v864_v60  ;;  %v893_v10 = vld [vmem:[#allocation2 + $0x1a] sm:$0x3]  ;;  %v873_v11 = vld [vmem:[#allocation2 + $0x18] sm:$0x3]  ;;  %1221 = vmatpush.msra.mxu1 %v986_v22  ;;  %1241 = vmatpush.msra.mxu2 %v1002_v23 }
 0x153   : > { %906 = vst.msk [vmem:[#allocation3 + $0x24] sm:$0xc] %vm723_vm4, %v904_v2  ;;  %v913_v13 = vld [vmem:[#allocation2 + $0x1c] sm:$0x3]  ;;  %v895_v14 = vrot.slane %v893_v10, 6  ;;  %v875_v15 = vrot.slane %v873_v11, 6 }
 0x154   : > { %926 = vst.msk [vmem:[#allocation3 + $0x28] sm:$0xc] %vm723_vm4, %v924_v4  ;;  %v915_v16 = vrot.slane %v913_v13, 6  ;;  %v947_v21 = vld [vmem:[#allocation2 + $0x1b] sm:$0x3]  ;;  %v1019_v24 = vld [vmem:[#allocation4 + $0x168] sm:$0xff] }
 0x155   : > { %v962_v59 = vld [vmem:[#allocation2 + $0x22] sm:$0x3]  ;;  %869 = vrot.lane.b32.xlu2 %v867_v54, %s1853_s24  ;;  %v942_v1 = vld [vmem:[#allocation2 + $0x20] sm:$0x3]  ;;  %941 = vst.msk [vmem:[#allocation3 + $0x2c] sm:$0x3] %vm717_vm3, %v940_v6  ;;  %1260 = vmatpush.msra.mxu3 %v1019_v24 }
 0x156   : > { %v964_v63 = vrot.slane %v962_v59, 6  ;;  %849 = vrot.lane.b32.xlu0 %v847_v57, %s1853_s24  ;;  %v944_v3 = vrot.slane %v942_v1, 6  ;;  %v953_v17 = vld [vmem:[#allocation2 + $0x21] sm:$0x3]  ;;  %v933_v18 = vld [vmem:[#allocation2 + $0x1f] sm:$0x3] }
 0x157   : > { %v955_v19 = vrot.slane %v953_v17, 6  ;;  %v935_v20 = vrot.slane %v933_v18, 6  ;;  %v985_v25 = vld [vmem:[#allocation4 + $0x58] sm:$0xff]  ;;  %v1018_v35 = vld [vmem:[#allocation4 + $0x160] sm:$0xff]  ;;  %v984_v5 = vld [vmem:[#allocation4 + $0x50] sm:$0xff] }
 0x158   : > { %889 = vrot.lane.b32.xlu1 %v887_v0, %s1853_s24  ;;  %966 = vst.msk [vmem:[#allocation3 + $0x30] sm:$0xc] %vm723_vm4, %v964_v63  ;;  %v1001_v26 = vld [vmem:[#allocation4 + $0xd8] sm:$0xff]  ;;  %v1000_v27 = vld [vmem:[#allocation4 + $0xd0] sm:$0xff]  ;;  %1222 = vmatpush.msra.mxu1 %v985_v25  ;;  %v983_v29 = vld [vmem:[#allocation4 + $0x48] sm:$0xff] }
 0x159   : > { %946 = vst.msk [vmem:[#allocation3 + $0x2c] sm:$0xc] %vm723_vm4, %v944_v3  ;;  %1242 = vmatpush.msra.mxu2 %v1001_v26  ;;  %v1017_v28 = vld [vmem:[#allocation4 + $0x158] sm:$0xff]  ;;  %1261 = vmatpush.msra.mxu3 %v1018_v35  ;;  %v999_v30 = vld [vmem:[#allocation4 + $0xc8] sm:$0xff]  ;;  %v1016_v31 = vld [vmem:[#allocation4 + $0x150] sm:$0xff] }
 0x15a   : > { %1223 = vmatpush.msra.mxu1 %v984_v5  ;;  %v982_v37 = vld [vmem:[#allocation4 + $0x40] sm:$0xff]  ;;  %v1015_v33 = vld [vmem:[#allocation4 + $0x148] sm:$0xff]  ;;  %v981_v34 = vld [vmem:[#allocation4 + $0x38] sm:$0xff] }
 0x15b   : > { %1243 = vmatpush.msra.mxu2 %v1000_v27  ;;  %1262 = vmatpush.msra.mxu3 %v1017_v28  ;;  %v998_v32 = vld [vmem:[#allocation4 + $0xc0] sm:$0xff]  ;;  %v997_v36 = vld [vmem:[#allocation4 + $0xb8] sm:$0xff]  ;;  %v980_v39 = vld [vmem:[#allocation4 + $0x30] sm:$0xff] }
 0x15c   : > { %1224 = vmatpush.msra.mxu1 %v983_v29  ;;  %v1014_v38 = vld [vmem:[#allocation4 + $0x140] sm:$0xff]  ;;  %v996_v40 = vld [vmem:[#allocation4 + $0xb0] sm:$0xff]  ;;  %v1013_v41 = vld [vmem:[#allocation4 + $0x138] sm:$0xff] }
 0x15d   : > { %929 = vrot.lane.b32.xlu2 %v927_v7, %s1853_s24  ;;  %1244 = vmatpush.msra.mxu2 %v999_v30  ;;  %v979_v42 = vld [vmem:[#allocation4 + $0x28] sm:$0xff]  ;;  %v978_v44 = vld [vmem:[#allocation4 + $0x20] sm:$0xff]  ;;  %v993_v48 = vld [vmem:[#allocation4 + $0x98] sm:$0xff] }
 0x15e   : > { %909 = vrot.lane.b32.xlu0 %v907_v8, %s1853_s24  ;;  %1263 = vmatpush.msra.mxu3 %v1016_v31  ;;  %v995_v12 = vld [vmem:[#allocation4 + $0xa8] sm:$0xff]  ;;  %v994_v45 = vld [vmem:[#allocation4 + $0xa0] sm:$0xff]  ;;  %v992_v51 = vld [vmem:[#allocation4 + $0x90] sm:$0xff] }
 0x15f   : > { %1225 = vmatpush.msra.mxu1 %v982_v37  ;;  %1245 = vmatpush.msra.mxu2 %v998_v32  ;;  %v1009_v52 = vld [vmem:[#allocation4 + $0x118] sm:$0xff]  ;;  %v975_v53 = vld [vmem:[#allocation4 + $0x8] sm:$0xff]  ;;  %v1008_v55 = vld [vmem:[#allocation4 + $0x110] sm:$0xff] }
 0x160   : > { %856 = vrot.lane.b32.xlu1 %v855_v9, %s1853_s24  ;;  %1264 = vmatpush.msra.mxu3 %v1015_v33  ;;  %v991_v54 = vld [vmem:[#allocation4 + $0x88] sm:$0xff]  ;;  %v974_v56 = vld [vmem:[#allocation4] sm:$0xff]  ;;  %v1037_v59 = vld [vmem:[#allocation4 + $0x1f8] sm:$0xff] }
 0x161   : > { %1226 = vmatpush.msra.mxu1 %v981_v34  ;;  %1246 = vmatpush.msra.mxu2 %v997_v36  ;;  %v990_v57 = vld [vmem:[#allocation4 + $0x80] sm:$0xff]  ;;  %v1007_v58 = vld [vmem:[#allocation4 + $0x108] sm:$0xff]  ;;  %v1053_v60 = vld [vmem:[#allocation4 + $0x278] sm:$0xff] }
 0x162   : > { %1265 = vmatpush.msra.mxu3 %v1014_v38  ;;  %v1006_v62 = vld [vmem:[#allocation4 + $0x100] sm:$0xff]  ;;  %v1036_v63 = vld [vmem:[#allocation4 + $0x1f0] sm:$0xff]  ;;  %v1069_v1 = vld [vmem:[#allocation4 + $0x2f8] sm:$0xff] }
 0x163   : > { %1227 = vmatpush.msra.mxu1 %v980_v39  ;;  %1247 = vmatpush.msra.mxu2 %v996_v40  ;;  %v1052_v0 = vld [vmem:[#allocation4 + $0x270] sm:$0xff]  ;;  %v1035_v2 = vld [vmem:[#allocation4 + $0x1e8] sm:$0xff]  ;;  %v1034_v6 = vld [vmem:[#allocation4 + $0x1e0] sm:$0xff] }
 0x164   : > { %1266 = vmatpush.msra.mxu3 %v1013_v41  ;;  %v1051_v3 = vld [vmem:[#allocation4 + $0x268] sm:$0xff]  ;;  %v1068_v4 = vld [vmem:[#allocation4 + $0x2f0] sm:$0xff]  ;;  %v1050_v7 = vld [vmem:[#allocation4 + $0x260] sm:$0xff] }
 0x165   : > { %896 = vrot.lane.b32.xlu2 %v895_v14, %s1853_s24  ;;  %1228 = vmatpush.msra.mxu1 %v979_v42  ;;  %v1067_v8 = vld [vmem:[#allocation4 + $0x2e8] sm:$0xff]  ;;  %v1033_v9 = vld [vmem:[#allocation4 + $0x1d8] sm:$0xff]  ;;  %v1066_v11 = vld [vmem:[#allocation4 + $0x2e0] sm:$0xff] }
 0x166   : > { %876 = vrot.lane.b32.xlu0 %v875_v15, %s1853_s24  ;;  %1248 = vmatpush.msra.mxu2 %v995_v12  ;;  %v1049_v10 = vld [vmem:[#allocation4 + $0x258] sm:$0xff]  ;;  %v1032_v13 = vld [vmem:[#allocation4 + $0x1d0] sm:$0xff]  ;;  %v1047_v17 = vld [vmem:[#allocation4 + $0x248] sm:$0xff] }
 0x167   : > { %1267 = vmatpush.msra.mxu3 %v1012_v43  ;;  %1229 = vmatpush.msra.mxu1 %v978_v44  ;;  %v1048_v14 = vld [vmem:[#allocation4 + $0x250] sm:$0xff]  ;;  %v1065_v15 = vld [vmem:[#allocation4 + $0x2d8] sm:$0xff]  ;;  %v1063_v22 = vld [vmem:[#allocation4 + $0x2c8] sm:$0xff] }
 0x168   : > { %916 = vrot.lane.b32.xlu1 %v915_v16, %s1853_s24  ;;  %1249 = vmatpush.msra.mxu2 %v994_v45  ;;  %v1031_v16 = vld [vmem:[#allocation4 + $0x1c8] sm:$0xff]  ;;  %v1064_v18 = vld [vmem:[#allocation4 + $0x2d0] sm:$0xff]  ;;  %v1029_v23 = vld [vmem:[#allocation4 + $0x1b8] sm:$0xff] }
 0x169   : > { %1268 = vmatpush.msra.mxu3 %v1011_v46  ;;  %1230 = vmatpush.msra.mxu1 %v977_v47  ;;  %v1045_v24 = vld [vmem:[#allocation4 + $0x238] sm:$0xff]  ;;  %v1062_v25 = vld [vmem:[#allocation4 + $0x2c0] sm:$0xff]  ;;  %v1028_v26 = vld [vmem:[#allocation4 + $0x1b0] sm:$0xff] }
 0x16a   : > { %1250 = vmatpush.msra.mxu2 %v993_v48  ;;  %v1044_v35 = vld [vmem:[#allocation4 + $0x230] sm:$0xff]  ;;  %v1061_v5 = vld [vmem:[#allocation4 + $0x2b8] sm:$0xff]  ;;  %v1027_v27 = vld [vmem:[#allocation4 + $0x1a8] sm:$0xff] }
 0x16b   : > { %1269 = vmatpush.msra.mxu3 %v1010_v49  ;;  %1231 = vmatpush.msra.mxu1 %v976_v50  ;;  %v1043_v28 = vld [vmem:[#allocation4 + $0x228] sm:$0xff]  ;;  %v1060_v29 = vld [vmem:[#allocation4 + $0x2b0] sm:$0xff]  ;;  %v1026_v31 = vld [vmem:[#allocation4 + $0x1a0] sm:$0xff] }
 0x16c   : > { %1251 = vmatpush.msra.mxu2 %v992_v51  ;;  %v1042_v37 = vld [vmem:[#allocation4 + $0x220] sm:$0xff]  ;;  %v1059_v32 = vld [vmem:[#allocation4 + $0x2a8] sm:$0xff]  ;;  %v1025_v33 = vld [vmem:[#allocation4 + $0x198] sm:$0xff] }
 0x16d   : > { %956 = vrot.lane.b32.xlu2 %v955_v19, %s1853_s24  ;;  %1270 = vmatpush.msra.mxu3 %v1009_v52  ;;  %v1041_v34 = vld [vmem:[#allocation4 + $0x218] sm:$0xff]  ;;  %v1058_v36 = vld [vmem:[#allocation4 + $0x2a0] sm:$0xff]  ;;  %v1024_v38 = vld [vmem:[#allocation4 + $0x190] sm:$0xff] }
 0x16e   : > { %936 = vrot.lane.b32.xlu0 %v935_v20, %s1853_s24  ;;  %1232 = vmatpush.msra.mxu1 %v975_v53  ;;  %v1030_v20 = vld [vmem:[#allocation4 + $0x1c0] sm:$0xff]  ;;  %v1040_v39 = vld [vmem:[#allocation4 + $0x210] sm:$0xff]  ;;  %v1057_v40 = vld [vmem:[#allocation4 + $0x298] sm:$0xff] }
 0x16f   : > { %1252 = vmatpush.msra.mxu2 %v991_v54  ;;  %1271 = vmatpush.msra.mxu3 %v1008_v55  ;;  %v1023_v41 = vld [vmem:[#allocation4 + $0x188] sm:$0xff]  ;;  %v1056_v12 = vld [vmem:[#allocation4 + $0x290] sm:$0xff]  ;;  %v1022_v45 = vld [vmem:[#allocation4 + $0x180] sm:$0xff] }
 0x170   : > { %949 = vrot.lane.b32.xlu1 %v947_v21, %s1853_s24  ;;  %1233 = vmatpush.msra.mxu1 %v974_v56  ;;  %v1046_v21 = vld [vmem:[#allocation4 + $0x240] sm:$0xff]  ;;  %v1039_v42 = vld [vmem:[#allocation4 + $0x208] sm:$0xff] }
 0x171   : > { %1253 = vmatpush.msra.mxu2 %v990_v57  ;;  %1272 = vmatpush.msra.mxu3 %v1007_v58  ;;  %v1038_v47 = vld [vmem:[#allocation4 + $0x200] sm:$0xff]  ;;  %v1055_v48 = vld [vmem:[#allocation4 + $0x288] sm:$0xff] }
 0x172   : > { %1278 = vmatpush.msrb.mxu1 %v1037_v59  ;;  %v1054_v49 = vld [vmem:[#allocation4 + $0x280] sm:$0xff] }
 0x173   : > { %1298 = vmatpush.msrb.mxu2 %v1053_v60  ;;  %1273 = vmatpush.msra.mxu3 %v1006_v62 }
 0x174   : > { %1279 = vmatpush.msrb.mxu1 %v1036_v63 }
 0x175   : > { %1299 = vmatpush.msrb.mxu2 %v1052_v0  ;;  %1318 = vmatpush.msrb.mxu3 %v1069_v1  ;;  %v1085_v0 = vld [vmem:[#allocation4 + $0x378] sm:$0xff] }
 0x176   : > { %1280 = vmatpush.msrb.mxu1 %v1035_v2  ;;  %v1101_v1 = vld [vmem:[#allocation4 + $0x3f8] sm:$0xff] }
 0x177   : > { %1300 = vmatpush.msrb.mxu2 %v1051_v3  ;;  %1319 = vmatpush.msrb.mxu3 %v1068_v4  ;;  %v1084_v3 = vld [vmem:[#allocation4 + $0x370] sm:$0xff] }
 0x178   : > { %1281 = vmatpush.msrb.mxu1 %v1034_v6 }
 0x179   : > { %1301 = vmatpush.msrb.mxu2 %v1050_v7  ;;  %1320 = vmatpush.msrb.mxu3 %v1067_v8  ;;  %v1100_v8 = vld [vmem:[#allocation4 + $0x3f0] sm:$0xff] }
 0x17a   : > { %1282 = vmatpush.msrb.mxu1 %v1033_v9  ;;  %v1117_v9 = vld [vmem:[#allocation4 + $0x478] sm:$0xff] }
 0x17b   : > { %1302 = vmatpush.msrb.mxu2 %v1049_v10  ;;  %1321 = vmatpush.msrb.mxu3 %v1066_v11  ;;  %v1083_v10 = vld [vmem:[#allocation4 + $0x368] sm:$0xff] }
 0x17c   : > { %1283 = vmatpush.msrb.mxu1 %v1032_v13  ;;  %v1099_v11 = vld [vmem:[#allocation4 + $0x3e8] sm:$0xff]  ;;  %v1116_v13 = vld [vmem:[#allocation4 + $0x470] sm:$0xff] }
 0x17d   : > { %1303 = vmatpush.msrb.mxu2 %v1048_v14  ;;  %1322 = vmatpush.msrb.mxu3 %v1065_v15  ;;  %v1082_v14 = vld [vmem:[#allocation4 + $0x360] sm:$0xff] }
 0x17e   : > { %1284 = vmatpush.msrb.mxu1 %v1031_v16  ;;  %v1098_v15 = vld [vmem:[#allocation4 + $0x3e0] sm:$0xff]  ;;  %v1115_v16 = vld [vmem:[#allocation4 + $0x468] sm:$0xff] }
 0x17f   : > { %1304 = vmatpush.msrb.mxu2 %v1047_v17  ;;  %1323 = vmatpush.msrb.mxu3 %v1064_v18  ;;  %v1081_v18 = vld [vmem:[#allocation4 + $0x358] sm:$0xff] }
 0x180   : > { %1285 = vmatpush.msrb.mxu1 %v1030_v20  ;;  %v1114_v20 = vld [vmem:[#allocation4 + $0x460] sm:$0xff] }
 0x181   : > { %1305 = vmatpush.msrb.mxu2 %v1046_v21  ;;  %1324 = vmatpush.msrb.mxu3 %v1063_v22  ;;  %v973_v22 = vld [vmem:[#allocation3 + $0x30] sm:$0xf] }
 0x182   : > { %1286 = vmatpush.msrb.mxu1 %v1029_v23 }
 0x183   : > { %1306 = vmatpush.msrb.mxu2 %v1045_v24  ;;  %1325 = vmatpush.msrb.mxu3 %v1062_v25  ;;  %v1080_v24 = vld [vmem:[#allocation4 + $0x350] sm:$0xff] }
 0x184   : > { %1287 = vmatpush.msrb.mxu1 %v1028_v26 }
 0x185   : > { %1307 = vmatpush.msrb.mxu2 %v1044_v35  ;;  %1326 = vmatpush.msrb.mxu3 %v1061_v5  ;;  %v1096_v35 = vld [vmem:[#allocation4 + $0x3d0] sm:$0xff]  ;;  %v1113_v5 = vld [vmem:[#allocation4 + $0x458] sm:$0xff] }
 0x186   : > { %1288 = vmatpush.msrb.mxu1 %v1027_v27  ;;  %v1079_v27 = vld [vmem:[#allocation4 + $0x348] sm:$0xff] }
 0x187   : > { %1308 = vmatpush.msrb.mxu2 %v1043_v28  ;;  %1327 = vmatpush.msrb.mxu3 %v1060_v29  ;;  %v1095_v28 = vld [vmem:[#allocation4 + $0x3c8] sm:$0xff]  ;;  %v1112_v29 = vld [vmem:[#allocation4 + $0x450] sm:$0xff] }
 0x188   : > { %1289 = vmatpush.msrb.mxu1 %v1026_v31  ;;  %v1094_v31 = vld [vmem:[#allocation4 + $0x3c0] sm:$0xff] }
 0x189   : > { %1309 = vmatpush.msrb.mxu2 %v1042_v37  ;;  %1328 = vmatpush.msrb.mxu3 %v1059_v32  ;;  %v1111_v37 = vld [vmem:[#allocation4 + $0x448] sm:$0xff] }
 0x18a   : > { %1290 = vmatpush.msrb.mxu1 %v1025_v33  ;;  %v1077_v33 = vld [vmem:[#allocation4 + $0x338] sm:$0xff] }
 0x18b   : > { %1310 = vmatpush.msrb.mxu2 %v1041_v34  ;;  %1329 = vmatpush.msrb.mxu3 %v1058_v36  ;;  %v1093_v36 = vld [vmem:[#allocation4 + $0x3b8] sm:$0xff] }
 0x18c   : > { %1291 = vmatpush.msrb.mxu1 %v1024_v38  ;;  %v1110_v38 = vld [vmem:[#allocation4 + $0x440] sm:$0xff] }
 0x18d   : > { %1311 = vmatpush.msrb.mxu2 %v1040_v39  ;;  %1330 = vmatpush.msrb.mxu3 %v1057_v40  ;;  %v1076_v39 = vld [vmem:[#allocation4 + $0x330] sm:$0xff] }
 0x18e   : > { %1292 = vmatpush.msrb.mxu1 %v1023_v41  ;;  %v1092_v40 = vld [vmem:[#allocation4 + $0x3b0] sm:$0xff]  ;;  %v1109_v41 = vld [vmem:[#allocation4 + $0x438] sm:$0xff] }
 0x18f   : > { %v770_v61 = vpop.permute.xlu2 %769  ;;  %1312 = vmatpush.msrb.mxu2 %v1039_v42  ;;  %1331 = vmatpush.msrb.mxu3 %v1056_v12  ;;  %v1075_v42 = vld [vmem:[#allocation4 + $0x328] sm:$0xff] }
 0x190   : > { %772 = vst.msk [vmem:[#allocation3 + $0x8] sm:$0x3] %vm730_vm5, %v770_v61  ;;  %1293 = vmatpush.msrb.mxu1 %v1022_v45  ;;  %v1091_v12 = vld [vmem:[#allocation4 + $0x3a8] sm:$0xff] }
 0x191   : > { %1313 = vmatpush.msrb.mxu2 %v1038_v47  ;;  %1332 = vmatpush.msrb.mxu3 %v1055_v48  ;;  %v1107_v47 = vld [vmem:[#allocation4 + $0x428] sm:$0xff] }
 0x193   : > { %1333 = vmatpush.msrb.mxu3 %v1054_v49 }
 0x197   : > { %v810_v19 = vpop.permute.xlu2 %809 }
 0x198   : > { %812 = vst.msk [vmem:[#allocation3 + $0x10] sm:$0x3] %vm730_vm5, %v810_v19  ;;  %v1097_v19 = vld [vmem:[#allocation4 + $0x3d8] sm:$0xff] }
 0x19f   : > { %v777_v30 = vpop.permute.xlu2 %776 }
 0x1a0   : > { %779 = vst.msk [vmem:[#allocation3 + $0x8] sm:$0xc] %vm738_vm6, %v777_v30  ;;  %v1078_v30 = vld [vmem:[#allocation4 + $0x340] sm:$0xff] }
 0x1a7   : > { %v750_v43 = vpop.permute.xlu1 %749  ;;  %v837_v44 = vpop.permute.xlu2 %836 }
 0x1a8   : > { %752 = vst.msk [vmem:[#allocation3 + $0x4] sm:$0x3] %vm730_vm5, %v750_v43  ;;  %v728_v46 = vpop.permute.xlu0 %727  ;;  %v1108_v43 = vld [vmem:[#allocation4 + $0x430] sm:$0xff] }
 0x1a9   : > { %731 = vst.msk [vmem:[#allocation3] sm:$0x3] %vm730_vm5, %v728_v46  ;;  %v1090_v46 = vld [vmem:[#allocation4 + $0x3a0] sm:$0xff] }
 0x1aa   : > { %839 = vst.msk [vmem:[#allocation3 + $0x14] sm:$0xc] %vm738_vm6, %v837_v44  ;;  %v1074_v44 = vld [vmem:[#allocation4 + $0x320] sm:$0xff] }
 0x1af   : > { %v870_v50 = vpop.permute.xlu2 %869 }
 0x1b0   : > { %v790_v51 = vpop.permute.xlu0 %789  ;;  %872 = vst.msk [vmem:[#allocation3 + $0x1c] sm:$0x3] %vm730_vm5, %v870_v50  ;;  %v1073_v50 = vld [vmem:[#allocation4 + $0x318] sm:$0xff] }
 0x1b1   : > { %792 = vst.msk [vmem:[#allocation3 + $0xc] sm:$0x3] %vm730_vm5, %v790_v51 }
 0x1b2   : > { %v757_v52 = vpop.permute.xlu1 %756 }
 0x1b3   : > { %759 = vst.msk [vmem:[#allocation3 + $0x4] sm:$0xc] %vm738_vm6, %v757_v52  ;;  %v1089_v52 = vld [vmem:[#allocation4 + $0x398] sm:$0xff] }
 0x1b7   : > { %v930_v53 = vpop.permute.xlu2 %929 }
 0x1b8   : > { %v736_v54 = vpop.permute.xlu0 %735  ;;  %932 = vst.msk [vmem:[#allocation3 + $0x28] sm:$0x3] %vm730_vm5, %v930_v53  ;;  %v1106_v53 = vld [vmem:[#allocation4 + $0x420] sm:$0xff] }
 0x1b9   : > { %739 = vst.msk [vmem:[#allocation3] sm:$0xc] %vm738_vm6, %v736_v54  ;;  %v1072_v54 = vld [vmem:[#allocation4 + $0x310] sm:$0xff] }
 0x1ba   : > { %v797_v55 = vpop.permute.xlu1 %796 }
 0x1bb   : > { %799 = vst.msk [vmem:[#allocation3 + $0xc] sm:$0xc] %vm738_vm6, %v797_v55  ;;  %v1088_v55 = vld [vmem:[#allocation4 + $0x390] sm:$0xff] }
 0x1bf   : > { %v897_v56 = vpop.permute.xlu2 %896 }
 0x1c0   : > { %v817_v57 = vpop.permute.xlu0 %816  ;;  %899 = vst.msk [vmem:[#allocation3 + $0x20] sm:$0xc] %vm738_vm6, %v897_v56  ;;  %v967_v58 = vld [vmem:[#allocation3] sm:$0xff]  ;;  %v1105_v56 = vld [vmem:[#allocation4 + $0x418] sm:$0xff] }
 0x1c1   : > { %819 = vst.msk [vmem:[#allocation3 + $0x10] sm:$0xc] %vm738_vm6, %v817_v57  ;;  %v1071_v57 = vld [vmem:[#allocation4 + $0x308] sm:$0xff] }
 0x1c2   : > { %v830_v59 = vpop.permute.xlu1 %829  ;;  %v968_v60 = vld [vmem:[#allocation3 + $0x8] sm:$0xff]  ;;  %1181 = vst [vmem:[#allocation1] ss:$2 sm:$0xff] %v967_v58  ;;  %v1087_v58 = vld [vmem:[#allocation4 + $0x388] sm:$0xff] }
 0x1c3   : > { %832 = vst.msk [vmem:[#allocation3 + $0x14] sm:$0x3] %vm730_vm5, %v830_v59  ;;  %v1104_v59 = vld [vmem:[#allocation4 + $0x410] sm:$0xff] }
 0x1c4   : > { %1183 = vst [vmem:[#allocation1 + $0x10] ss:$2 sm:$0xff] %v968_v60  ;;  %v1070_v60 = vld [vmem:[#allocation4 + $0x300] sm:$0xff] }
 0x1c7   : > { %v957_v62 = vpop.permute.xlu2 %956 }
 0x1c8   : > { %v850_v63 = vpop.permute.xlu0 %849  ;;  %959 = vst.msk [vmem:[#allocation3 + $0x2c] sm:$0xc] %vm738_vm6, %v957_v62  ;;  %v1086_v62 = vld [vmem:[#allocation4 + $0x380] sm:$0xff] }
 0x1c9   : > { %852 = vst.msk [vmem:[#allocation3 + $0x18] sm:$0x3] %vm730_vm5, %v850_v63  ;;  %v1188_v61 = vld.sshfl [vmem:[#allocation1] sm:$0xff pattern:$0x75316420]  ;;  %v1103_v63 = vld [vmem:[#allocation4 + $0x408] sm:$0xff] }
 0x1ca   : > { %v890_v2 = vpop.permute.xlu1 %889  ;;  %v969_v4 = vld [vmem:[#allocation3 + $0x10] sm:$0xff]  ;;  %v1189_v6 = vld.sshfl [vmem:[#allocation1 + $0x8] sm:$0xff pattern:$0x75316420]  ;;  %1234 = vmatmul.f32.vlgmr.msra.gmra.mxu1 %v1188_v61 }
 0x1cb   : > { %1254 = vmatmul.f32.vlgmr.msra.gmra.mxu2 %v1189_v6  ;;  %892 = vst.msk [vmem:[#allocation3 + $0x20] sm:$0x3] %vm730_vm5, %v890_v2  ;;  %v1190_v7 = vld.sshfl [vmem:[#allocation1 + $0x10] sm:$0xff pattern:$0x75316420]  ;;  %1338 = vmatpush.msra.mxu1 %v1085_v0  ;;  %v1133_v0 = vld [vmem:[#allocation4 + $0x4f8] sm:$0xff] }
 0x1cc   : > { %1358 = vmatpush.msra.mxu2 %v1101_v1  ;;  %1185 = vst [vmem:[#allocation1 + $0x20] ss:$2 sm:$0xff] %v969_v4  ;;  %1274 = vmatmul.f32.vlgmr.msra.gmra.mxu3 %v1190_v7  ;;  %v1191_v23 = vld.sshfl [vmem:[#allocation1 + $0x18] sm:$0xff pattern:$0x75316420]  ;;  %v1102_v61 = vld [vmem:[#allocation4 + $0x400] sm:$0xff] }
 0x1cd   : > { %1339 = vmatpush.msra.mxu1 %v1084_v3  ;;  %1378 = vmatpush.msra.mxu3 %v1117_v9  ;;  %v1149_v1 = vld [vmem:[#allocation4 + $0x578] sm:$0xff]  ;;  %v1132_v6 = vld [vmem:[#allocation4 + $0x4f0] sm:$0xff] }
 0x1ce   : > { %1359 = vmatpush.msra.mxu2 %v1100_v8  ;;  %v1148_v7 = vld [vmem:[#allocation4 + $0x570] sm:$0xff]  ;;  %v1165_v8 = vld [vmem:[#allocation4 + $0x5f8] sm:$0xff] }
 0x1cf   : > { %1340 = vmatpush.msra.mxu1 %v1083_v10  ;;  %1379 = vmatpush.msra.mxu3 %v1116_v13  ;;  %v1131_v10 = vld [vmem:[#allocation4 + $0x4e8] sm:$0xff]  ;;  %v1164_v13 = vld [vmem:[#allocation4 + $0x5f0] sm:$0xff] }
 0x1d0   : > { %1360 = vmatpush.msra.mxu2 %v1099_v11  ;;  %v910_v17 = vpop.permute.xlu0 %909  ;;  %v1147_v11 = vld [vmem:[#allocation4 + $0x568] sm:$0xff] }
 0x1d1   : > { %912 = vst.msk [vmem:[#allocation3 + $0x24] sm:$0x3] %vm730_vm5, %v910_v17  ;;  %1341 = vmatpush.msra.mxu1 %v1082_v14  ;;  %1380 = vmatpush.msra.mxu3 %v1115_v16  ;;  %v1130_v14 = vld [vmem:[#allocation4 + $0x4e0] sm:$0xff]  ;;  %v1163_v16 = vld [vmem:[#allocation4 + $0x5e8] sm:$0xff]  ;;  %v1129_v17 = vld [vmem:[#allocation4 + $0x4d8] sm:$0xff] }
 0x1d2   : > { %v857_v21 = vpop.permute.xlu1 %856  ;;  %1361 = vmatpush.msra.mxu2 %v1098_v15  ;;  %1294 = vmatmul.f32.vlgmr.msrb.gmra.mxu1 %v1191_v23  ;;  %v1146_v15 = vld [vmem:[#allocation4 + $0x560] sm:$0xff]  ;;  %v1127_v23 = vld [vmem:[#allocation4 + $0x4c8] sm:$0xff] }
 0x1d3   : > { %859 = vst.msk [vmem:[#allocation3 + $0x18] sm:$0xc] %vm738_vm6, %v857_v21  ;;  %v1192_v25 = vld.sshfl [vmem:[#allocation1 + $0x20] sm:$0xff pattern:$0x75316420]  ;;  %1342 = vmatpush.msra.mxu1 %v1081_v18  ;;  %1381 = vmatpush.msra.mxu3 %v1114_v20  ;;  %v1128_v20 = vld [vmem:[#allocation4 + $0x4d0] sm:$0xff] }
 0x1d4   : > { %v1193_v26 = vld.sshfl [vmem:[#allocation1 + $0x28] sm:$0xff pattern:$0x75316420]  ;;  %1362 = vmatpush.msra.mxu2 %v1097_v19  ;;  %v1145_v18 = vld [vmem:[#allocation4 + $0x558] sm:$0xff]  ;;  %v1144_v21 = vld [vmem:[#allocation4 + $0x550] sm:$0xff] }
 0x1d5   : > { %1198 = vst [vmem:[#allocation1 + $0x20] ss:$2 sm:$0xff] %v973_v22  ;;  %1314 = vmatmul.f32.vlgmr.msrb.gmra.mxu2 %v1192_v25  ;;  %1334 = vmatmul.f32.vlgmr.msrb.gmra.mxu3 %v1193_v26  ;;  %v1162_v19 = vld [vmem:[#allocation4 + $0x5e0] sm:$0xff]  ;;  %v1161_v22 = vld [vmem:[#allocation4 + $0x5d8] sm:$0xff]  ;;  %v1160_v25 = vld [vmem:[#allocation4 + $0x5d0] sm:$0xff] }
 0x1d6   : > { %1343 = vmatpush.msra.mxu1 %v1080_v24  ;;  %1363 = vmatpush.msra.mxu2 %v1096_v35  ;;  %v1143_v24 = vld [vmem:[#allocation4 + $0x548] sm:$0xff]  ;;  %v1126_v26 = vld [vmem:[#allocation4 + $0x4c0] sm:$0xff] }
 0x1d7   : > { %1382 = vmatpush.msra.mxu3 %v1113_v5  ;;  %v1142_v35 = vld [vmem:[#allocation4 + $0x540] sm:$0xff]  ;;  %v1159_v5 = vld [vmem:[#allocation4 + $0x5c8] sm:$0xff] }
 0x1d8   : > { %1344 = vmatpush.msra.mxu1 %v1079_v27  ;;  %v877_v32 = vpop.permute.xlu0 %876  ;;  %1364 = vmatpush.msra.mxu2 %v1095_v28  ;;  %v1125_v27 = vld [vmem:[#allocation4 + $0x4b8] sm:$0xff] }
 0x1d9   : > { %1383 = vmatpush.msra.mxu3 %v1112_v29  ;;  %879 = vst.msk [vmem:[#allocation3 + $0x1c] sm:$0xc] %vm738_vm6, %v877_v32  ;;  %v1141_v28 = vld [vmem:[#allocation4 + $0x538] sm:$0xff]  ;;  %v1158_v29 = vld [vmem:[#allocation4 + $0x5c0] sm:$0xff]  ;;  %v1123_v32 = vld [vmem:[#allocation4 + $0x4a8] sm:$0xff] }
 0x1da   : > { %v917_v34 = vpop.permute.xlu1 %916  ;;  %1345 = vmatpush.msra.mxu1 %v1078_v30  ;;  %1365 = vmatpush.msra.mxu2 %v1094_v31  ;;  %v1124_v30 = vld [vmem:[#allocation4 + $0x4b0] sm:$0xff] }
 0x1db   : > { %919 = vst.msk [vmem:[#allocation3 + $0x24] sm:$0xc] %vm738_vm6, %v917_v34  ;;  %1384 = vmatpush.msra.mxu3 %v1111_v37  ;;  %v1140_v31 = vld [vmem:[#allocation4 + $0x530] sm:$0xff]  ;;  %v1157_v37 = vld [vmem:[#allocation4 + $0x5b8] sm:$0xff] }
 0x1dc   : > { %1346 = vmatpush.msra.mxu1 %v1077_v33  ;;  %1366 = vmatpush.msra.mxu2 %v1093_v36  ;;  %v1139_v33 = vld [vmem:[#allocation4 + $0x528] sm:$0xff]  ;;  %v1156_v34 = vld [vmem:[#allocation4 + $0x5b0] sm:$0xff]  ;;  %v1122_v36 = vld [vmem:[#allocation4 + $0x4a0] sm:$0xff] }
 0x1dd   : > { %1385 = vmatpush.msra.mxu3 %v1110_v38  ;;  %v1138_v38 = vld [vmem:[#allocation4 + $0x520] sm:$0xff] }
 0x1de   : > { %1347 = vmatpush.msra.mxu1 %v1076_v39  ;;  %1367 = vmatpush.msra.mxu2 %v1092_v40  ;;  %v1155_v39 = vld [vmem:[#allocation4 + $0x5a8] sm:$0xff]  ;;  %v1121_v40 = vld [vmem:[#allocation4 + $0x498] sm:$0xff] }
 0x1df   : > { %1386 = vmatpush.msra.mxu3 %v1109_v41  ;;  %v1137_v41 = vld [vmem:[#allocation4 + $0x518] sm:$0xff] }
 0x1e0   : > { %v970_v45 = vld [vmem:[#allocation3 + $0x18] sm:$0xff]  ;;  %1348 = vmatpush.msra.mxu1 %v1075_v42  ;;  %v937_v48 = vpop.permute.xlu0 %936  ;;  %1368 = vmatpush.msra.mxu2 %v1091_v12  ;;  %v1120_v12 = vld [vmem:[#allocation4 + $0x490] sm:$0xff] }
 0x1e1   : > { %1187 = vst [vmem:[#allocation1 + $0x30] ss:$2 sm:$0xff] %v970_v45  ;;  %1387 = vmatpush.msra.mxu3 %v1108_v43  ;;  %v1154_v42 = vld [vmem:[#allocation4 + $0x5a0] sm:$0xff]  ;;  %v1136_v43 = vld [vmem:[#allocation4 + $0x510] sm:$0xff]  ;;  %v1119_v45 = vld [vmem:[#allocation4 + $0x488] sm:$0xff] }
 0x1e2   : > { %v971_v49 = vld [vmem:[#allocation3 + $0x20] sm:$0xff]  ;;  %v950_v51 = vpop.permute.xlu1 %949  ;;  %1349 = vmatpush.msra.mxu1 %v1074_v44  ;;  %1369 = vmatpush.msra.mxu2 %v1090_v46  ;;  %939 = vst.msk [vmem:[#allocation3 + $0x28] sm:$0xc] %vm738_vm6, %v937_v48  ;;  %v1153_v44 = vld [vmem:[#allocation4 + $0x598] sm:$0xff]  ;;  %v1118_v48 = vld [vmem:[#allocation4 + $0x480] sm:$0xff] }
 0x1e3   : > { %1196 = vst [vmem:[#allocation1] ss:$2 sm:$0xff] %v971_v49  ;;  %1388 = vmatpush.msra.mxu3 %v1107_v47  ;;  %v1135_v46 = vld [vmem:[#allocation4 + $0x508] sm:$0xff]  ;;  %v1152_v47 = vld [vmem:[#allocation4 + $0x590] sm:$0xff]  ;;  %v1134_v49 = vld [vmem:[#allocation4 + $0x500] sm:$0xff] }
 0x1e4   : > { %1350 = vmatpush.msra.mxu1 %v1073_v50  ;;  %952 = vst.msk [vmem:[#allocation3 + $0x2c] sm:$0x3] %vm730_vm5, %v950_v51  ;;  %1370 = vmatpush.msra.mxu2 %v1089_v52  ;;  %v1151_v50 = vld [vmem:[#allocation4 + $0x588] sm:$0xff]  ;;  %v1173_v51 = vld [vmem:[#allocation4 + $0x638] sm:$0xff]  ;;  %v1150_v52 = vld [vmem:[#allocation4 + $0x580] sm:$0xff] }
 0x1e5   : > { %1389 = vmatpush.msra.mxu3 %v1106_v53 }
 0x1e6   : > { %1351 = vmatpush.msra.mxu1 %v1072_v54  ;;  %1371 = vmatpush.msra.mxu2 %v1088_v55  ;;  %v1172_v55 = vld [vmem:[#allocation4 + $0x630] sm:$0xff] }
 0x1e7   : > { %1390 = vmatpush.msra.mxu3 %v1105_v56 }
 0x1e8   : > { %1352 = vmatpush.msra.mxu1 %v1071_v57  ;;  %1372 = vmatpush.msra.mxu2 %v1087_v58  ;;  %v1194_v2 = vld.sshfl [vmem:[#allocation1 + $0x30] sm:$0xff pattern:$0x75316420]  ;;  %v1195_v3 = vld.sshfl [vmem:[#allocation1 + $0x38] sm:$0xff pattern:$0x75316420] }
 0x1e9   : > { %1391 = vmatpush.msra.mxu3 %v1104_v59  ;;  %v1171_v57 = vld [vmem:[#allocation4 + $0x628] sm:$0xff]  ;;  %v1170_v58 = vld [vmem:[#allocation4 + $0x620] sm:$0xff]  ;;  %v1169_v59 = vld [vmem:[#allocation4 + $0x618] sm:$0xff] }
 0x1ea   : > { %1353 = vmatpush.msra.mxu1 %v1070_v60  ;;  %1373 = vmatpush.msra.mxu2 %v1086_v62  ;;  %v1199_v9 = vld.sshfl [vmem:[#allocation1] sm:$0xff pattern:$0x75316420]  ;;  %v1200_v53 = vld.sshfl [vmem:[#allocation1 + $0x8] sm:$0xff pattern:$0x75316420] }
 0x1eb   : > { %v972_v4 = vld [vmem:[#allocation3 + $0x28] sm:$0xff]  ;;  %1392 = vmatpush.msra.mxu3 %v1103_v63  ;;  %1354 = vmatmul.f32.vlgmr.msra.gmra.mxu1 %v1194_v2  ;;  %v1167_v62 = vld [vmem:[#allocation4 + $0x608] sm:$0xff]  ;;  %v1166_v63 = vld [vmem:[#allocation4 + $0x600] sm:$0xff] }
 0x1ec   : > { %1197 = vst [vmem:[#allocation1 + $0x10] ss:$2 sm:$0xff] %v972_v4  ;;  %1398 = vmatpush.msrb.mxu1 %v1133_v0  ;;  %1418 = vmatpush.msrb.mxu2 %v1149_v1  ;;  %v1168_v60 = vld [vmem:[#allocation4 + $0x610] sm:$0xff]  ;;  %v1203_v0 = vld.sshfl [vmem:[#allocation1 + $0x20] sm:$0xff pattern:$0x75316420] }
 0x1ed   : > { %1374 = vmatmul.f32.vlgmr.msra.gmra.mxu2 %v1195_v3  ;;  %1393 = vmatpush.msra.mxu3 %v1102_v61  ;;  %v1512_v1 = vld [vmem:[%s2316_s7 + $0x78] sm:$0xff]  ;;  %v1511_v2 = vld [vmem:[%s2316_s7 + $0x70] sm:$0xff]  ;;  %v1510_v3 = vld [vmem:[%s2316_s7 + $0x68] sm:$0xff] }
 0x1ee   : > { %1399 = vmatpush.msrb.mxu1 %v1132_v6  ;;  %1419 = vmatpush.msrb.mxu2 %v1148_v7  ;;  %v1509_v4 = vld [vmem:[%s2316_s7 + $0x60] sm:$0xff]  ;;  %v1508_v6 = vld [vmem:[%s2316_s7 + $0x58] sm:$0xff] }
 0x1ef   : > { %1438 = vmatpush.msrb.mxu3 %v1165_v8 }
 0x1f0   : > { %1394 = vmatmul.f32.vlgmr.msra.gmra.mxu3 %v1199_v9  ;;  %1400 = vmatpush.msrb.mxu1 %v1131_v10 }
 0x1f1   : > { %1420 = vmatpush.msrb.mxu2 %v1147_v11  ;;  %1439 = vmatpush.msrb.mxu3 %v1164_v13 }
 0x1f2   : > { %1401 = vmatpush.msrb.mxu1 %v1130_v14 }
 0x1f3   : > { %1421 = vmatpush.msrb.mxu2 %v1146_v15  ;;  %1440 = vmatpush.msrb.mxu3 %v1163_v16  ;;  %v1201_v54 = vld.sshfl [vmem:[#allocation1 + $0x10] sm:$0xff pattern:$0x75316420]  ;;  %v1202_v56 = vld.sshfl [vmem:[#allocation1 + $0x18] sm:$0xff pattern:$0x75316420] }
 0x1f4   : > { %1402 = vmatpush.msrb.mxu1 %v1129_v17  ;;  %v1507_v17 = vld [vmem:[%s2316_s7 + $0x50] sm:$0xff] }
 0x1f5   : > { %1422 = vmatpush.msrb.mxu2 %v1145_v18  ;;  %1441 = vmatpush.msrb.mxu3 %v1162_v19  ;;  %v1506_v19 = vld [vmem:[%s2316_s7 + $0x48] sm:$0xff] }
 0x1f6   : > { %1403 = vmatpush.msrb.mxu1 %v1128_v20 }
 0x1f7   : > { %1423 = vmatpush.msrb.mxu2 %v1144_v21  ;;  %1442 = vmatpush.msrb.mxu3 %v1161_v22  ;;  %v1505_v21 = vld [vmem:[%s2316_s7 + $0x40] sm:$0xff] }
 0x1f8   : > { %1404 = vmatpush.msrb.mxu1 %v1127_v23 }
 0x1f9   : > { %1424 = vmatpush.msrb.mxu2 %v1143_v24  ;;  %1443 = vmatpush.msrb.mxu3 %v1160_v25  ;;  %v1504_v24 = vld [vmem:[%s2316_s7 + $0x38] sm:$0xff] }
 0x1fa   : > { %1405 = vmatpush.msrb.mxu1 %v1126_v26  ;;  %v1503_v26 = vld [vmem:[%s2316_s7 + $0x30] sm:$0xff] }
 0x1fb   : > { %1425 = vmatpush.msrb.mxu2 %v1142_v35  ;;  %1444 = vmatpush.msrb.mxu3 %v1159_v5  ;;  %v1502_v5 = vld [vmem:[%s2316_s7 + $0x28] sm:$0xff] }
 0x1fc   : > { %1406 = vmatpush.msrb.mxu1 %v1125_v27 }
 0x1fd   : > { %1426 = vmatpush.msrb.mxu2 %v1141_v28  ;;  %1445 = vmatpush.msrb.mxu3 %v1158_v29  ;;  %v1541_v28 = vld [vmem:[%s2319_s10 + $0x18] sm:$0xff] }
 0x1fe   : > { %1407 = vmatpush.msrb.mxu1 %v1124_v30  ;;  %v1501_v30 = vld [vmem:[%s2316_s7 + $0x20] sm:$0xff] }
 0x1ff   : > { %1427 = vmatpush.msrb.mxu2 %v1140_v31  ;;  %1446 = vmatpush.msrb.mxu3 %v1157_v37 }
 0x200   : > { %1408 = vmatpush.msrb.mxu1 %v1123_v32  ;;  %v1500_v32 = vld [vmem:[%s2316_s7 + $0x18] sm:$0xff] }
 0x201   : > { %1428 = vmatpush.msrb.mxu2 %v1139_v33  ;;  %1447 = vmatpush.msrb.mxu3 %v1156_v34  ;;  %v1499_v34 = vld [vmem:[%s2316_s7 + $0x10] sm:$0xff] }
 0x202   : > { %1409 = vmatpush.msrb.mxu1 %v1122_v36 }
 0x203   : > { %1429 = vmatpush.msrb.mxu2 %v1138_v38  ;;  %1448 = vmatpush.msrb.mxu3 %v1155_v39  ;;  %v1498_v38 = vld [vmem:[%s2316_s7 + $0x8] sm:$0xff] }
 0x204   : > { %1410 = vmatpush.msrb.mxu1 %v1121_v40  ;;  %v1748_v40 = vld [vmem:[%s2314_s5] ss:$0 sm:$0xff] }
 0x205   : > { %1430 = vmatpush.msrb.mxu2 %v1137_v41  ;;  %1449 = vmatpush.msrb.mxu3 %v1154_v42  ;;  %v1497_v41 = vld [vmem:[%s2316_s7] sm:$0xff] }
 0x206   : > { %1411 = vmatpush.msrb.mxu1 %v1120_v12 }
 0x207   : > { %1431 = vmatpush.msrb.mxu2 %v1136_v43  ;;  %1450 = vmatpush.msrb.mxu3 %v1153_v44  ;;  %v1749_v43 = vld [vmem:[%s2315_s6] ss:$0 sm:$0xff] }
 0x208   : > { %1412 = vmatpush.msrb.mxu1 %v1119_v45 }
 0x209   : > { %1432 = vmatpush.msrb.mxu2 %v1135_v46  ;;  %1451 = vmatpush.msrb.mxu3 %v1152_v47 }
 0x20a   : > { %1413 = vmatpush.msrb.mxu1 %v1118_v48 }
 0x20b   : > { %1433 = vmatpush.msrb.mxu2 %v1134_v49  ;;  %1452 = vmatpush.msrb.mxu3 %v1151_v50 }
 0x20c   : > { %1414 = vmatmul.f32.vlgmr.msrb.gmra.mxu1 %v1200_v53  ;;  %1434 = vmatmul.f32.vlgmr.msrb.gmra.mxu2 %v1201_v54  ;;  %v1540_v54 = vld [vmem:[%s2319_s10 + $0x10] sm:$0xff] }
 0x20d   : > { %1466 = vmatpush.msra.mxu1 %v1173_v51  ;;  %1453 = vmatpush.msrb.mxu3 %v1150_v52 }
 0x20e   : > { %1454 = vmatmul.f32.vlgmr.msrb.gmra.mxu3 %v1202_v56  ;;  %1513 = vmatpush.msra.mxu2 %v1512_v1  ;;  %v1538_v56 = vld [vmem:[%s2319_s10] sm:$0xff] }
 0x20f   : > { %1467 = vmatpush.msra.mxu1 %v1172_v55  ;;  %1558 = vmatpush.msra.mxu3 %v1541_v28  ;;  %v1539_v55 = vld [vmem:[%s2319_s10 + $0x8] sm:$0xff] }
 0x210   : > { %1514 = vmatpush.msra.mxu2 %v1511_v2  ;;  %v1568_v2 = vld [vmem:[%s2321_s12] sm:$0x1] }
 0x211   : > { %1468 = vmatpush.msra.mxu1 %v1171_v57  ;;  %1559 = vmatpush.msra.mxu3 %v1540_v54  ;;  %v1533_v57 = vld [vmem:[%s2317_s8] sm:$0x1] }
 0x212   : > { %1515 = vmatpush.msra.mxu2 %v1510_v3 }
 0x213   : > { %1469 = vmatpush.msra.mxu1 %v1170_v58  ;;  %1560 = vmatpush.msra.mxu3 %v1539_v55 }
 0x214   : > { %1516 = vmatpush.msra.mxu2 %v1509_v4 }
 0x215   : > { %1470 = vmatpush.msra.mxu1 %v1169_v59  ;;  %1561 = vmatpush.msra.mxu3 %v1538_v56  ;;  %v1535_v59 = vld [vmem:[%s2318_s9] sm:$0x1] }
 0x216   : > { %1517 = vmatpush.msra.mxu2 %v1508_v6 }
 0x217   : > { %1471 = vmatpush.msra.mxu1 %v1168_v60 }
 0x218   : > { %1518 = vmatpush.msra.mxu2 %v1507_v17 }
 0x219   : > { %1472 = vmatpush.msra.mxu1 %v1167_v62 }
 0x21a   : > { %1519 = vmatpush.msra.mxu2 %v1506_v19 }
 0x21b   : > { %1473 = vmatpush.msra.mxu1 %v1166_v63 }
 0x21c   : > { %1688 = vmatmul.msk.f32.vlgmr.msra.gmra.mxu1 %vm710_vm2, %v1203_v0  ;;  %1520 = vmatpush.msra.mxu2 %v1505_v21  ;;  %v1566_v0 = vld [vmem:[%s2320_s11] sm:$0x1] }
 0x21e   : > { %1521 = vmatpush.msra.mxu2 %v1504_v24 }
 0x220   : > { %1522 = vmatpush.msra.mxu2 %v1503_v26 }
 0x222   : > { %1523 = vmatpush.msra.mxu2 %v1502_v5 }
 0x224   : > { %1524 = vmatpush.msra.mxu2 %v1501_v30 }
 0x226   : > { %1525 = vmatpush.msra.mxu2 %v1500_v32 }
 0x228   : > { %1526 = vmatpush.msra.mxu2 %v1499_v34 }
 0x22a   : > { %1527 = vmatpush.msra.mxu2 %v1498_v38 }
 0x22c   : > { %1528 = vmatpush.msra.mxu2 %v1497_v41 }
 0x247   : > { %v1235_v61 = vpop.f32.mrf.mxu1 }
 0x24e   : > { %v1255_v7 = vpop.f32.mrf.mxu2 }
 0x24f   : > { %v1256_v8 = vadd.f32 %v1255_v7, %v1235_v61  ;;  %v1275_v9 = vpop.f32.mrf.mxu3  ;;  %v1295_v11 = vpop.f32.mrf.mxu1 }
 0x251   : > { %v1276_v10 = vadd.f32 %v1275_v9, %v1256_v8 }
 0x253   : > { %v1296_v14 = vadd.f32 %v1295_v11, %v1276_v10 }
 0x258   : > { %v1315_v13 = vpop.f32.mrf.mxu2  ;;  %v1335_v16 = vpop.f32.mrf.mxu3 }
 0x259   : > { %v1316_v15 = vadd.f32 %v1315_v13, %v1296_v14 }
 0x25b   : > { %v1336_v20 = vadd.f32 %v1335_v16, %v1316_v15 }
 0x268   : > { %v1355_v18 = vpop.f32.mrf.mxu1 }
 0x269   : > { %v1356_v23 = vadd.f32 %v1355_v18, %v1336_v20 }
 0x270   : > { %v1375_v22 = vpop.f32.mrf.mxu2 }
 0x271   : > { %v1376_v25 = vadd.f32 %v1375_v22, %v1356_v23 }
 0x273   : > { %v1395_v35 = vpop.f32.mrf.mxu3 }
 0x274   : > { %v1396_v29 = vadd.f32 %v1395_v35, %v1376_v25 }
 0x289   : > { %v1415_v27 = vpop.f32.mrf.mxu1 }
 0x28a   : > { %v1416_v37 = vadd.f32 %v1415_v27, %v1396_v29 }
 0x28f   : > { %v1435_v31 = vpop.f32.mrf.mxu2 }
 0x290   : > { %v1436_v33 = vadd.f32 %v1435_v31, %v1416_v37 }
 0x291   : > { %v1455_v36 = vpop.f32.mrf.mxu3 }
 0x292   : > { %v1456_v39 = vadd.f32 %v1455_v36, %v1436_v33 }
 0x299   : > { %v1475_v42 = vpop.f32.mrf.mxu1 }
 0x29a   : > { %v1476_v12 = vadd.f32 %v1475_v42, %v1456_v39 }
 0x29c   : > { %v1482_v44 = vmul.f32 %v1748_v40, %v1476_v12 }
 0x29e   : > { %v1487_v45 = vadd.f32 %v1749_v43, %v1482_v44 }
 0x2a0   : > { %v1488_v46 = vmax.f32 %v1487_v45, 0.0 }
 0x2a2   : > { %v1490_v47 = vsel %vm1489_vm7, %v1488_v46, -inf }
 0x2a3   : > { %v1491_v48 = vrot.slane %v1490_v47, 4 }
 0x2a5   : > { %v1492_v49 = vmax.f32 %v1490_v47, %v1491_v48 }
 0x2a7   : > { %v1493_v50 = vrot.slane %v1492_v49, 2 }
 0x2a9   : > { %v1494_v51 = vmax.f32 %v1492_v49, %v1493_v50 }
 0x2ab   : > { %v1495_v52 = vrot.slane %v1494_v51, 1 }
 0x2ad   : > { %v1496_v53 = vmax.f32 %v1494_v51, %v1495_v52 }
 0x2af   : > { %1529 = vmatmul.f32.vlgmr.msra.gmra.mxu2 %v1496_v53 }
 0x332   : > { %v1530_v58 = vpop.f32.mrf.mxu2 }
 0x333   : > { %v1534_v60 = vmul.f32 %v1533_v57, %v1530_v58 }
 0x335   : > { %v1536_v62 = vadd.f32 %v1535_v59, %v1534_v60 }
 0x337   : > { %v1537_v63 = vmax.f32 %v1536_v62, 0.0 }
 0x339   : > { %1689 = vmatmul.msk.f32.vlgmr.msra.gmra.mxu3 %vm1542_vm8, %v1537_v63  ;;  %1573 = vst.msk [vmem:[%s449_s16] sm:$0x1] %vm1572_vm9, %v1537_v63 }
 0x3bc   : > { %v1563_v1 = vpop.f32.mrf.mxu3 }
 0x3bd   : > { %v1567_v3 = vmul.f32 %v1566_v0, %v1563_v1 }
 0x3bf   : > { %v1569_v4 = vadd.f32 %v1568_v2, %v1567_v3 }
 0x3c1   : > { %v1570_v61 = vmul.f32 1.442695, %v1569_v4 }
 0x3c3   : > { %1750 = vpow2.f32 %v1570_v61 }
 0x3c9   : > { %v1751_v6 = vpop.eup %1750 }
 0x3ca   : > { %1575 = vrot.lane.b32.xlu0 %v1751_v6, %s1853_s24 }
 0x43c   : > { %v1576_v7 = vpop.permute.xlu0 %1575 }
 0x43d   : > { %1579 = vst.msk [vmem:[%s449_s16] sm:$0x1] %vm1578_vm10, %v1576_v7 }
 0x43e   : > { %1809 = shalt.err (!%p1806_p8)
}
 0x43f   : > { %1697 = dma.vmem_to_hbm [thread:$0]  (%p1962_p5), %s1592_s4, 16, %s1594_s17, %s1581_s21  }
 0x440 PF: > { %p1709_p9 = scmp.ge.s32.totalorder %s1848_s28, 2  ;;  %s1605_s20 = sand.u32 1, %s1836_s25  }
 0x441   : > { %s1606_s16 = scalar_lea.sflag [#allocation6], %s1605_s20 }
 0x442   : > { %p1704_p10 = pnand %p1709_p9, %p1966_p6 }
 0x444   : > { %p1705_p11 = pneg %p1704_p10 }
 0x446   : > { %1831 = dma.done.wait (%p1705_p11), %s1606_s16, 16  }
 0x447   : > { %1833 = vsyncadd (%p1705_p11), %s1606_s16, 4294967280  ;;  %s2333_s28 = sld [smem:[#allocation11_spill]]  ;;  %s2336_s25 = smov %s1840_s26 }
 0x448   : > { %s2334_s15 = sld [smem:[#allocation10_spill]] }
 0x449   : > { %s2335_s27 = sld [smem:[#allocation12_spill]] }
 0x44d   : > { %p24_p12 = scmp.ge.s32.totalorder %s2333_s28, 4  }
 0x44e   : > { %s2337_s26 = smov %s2334_s15 }
 0x44f   :  { %26 = sbr.rel (!%p24_p12) target bundleno = 6 (0x6), region = 115 }
 0x454   :  { %1611 = vsyncpa [#allocation5], 1 }
 0x455   :  { %1613 = vsyncpa [#allocation5 + $0x1], 1 }
 0x456   :  { %1614 = vsyncpa [#allocation6], 1 }
 0x457   :  { %1616 = vsyncpa [#allocation6 + $0x1], 1 }

</bundles_post_ra>
